<compile_context>
chip_gen: v7x
topology: tpu7x:2x2x1
jax: 0.10.0
libtpu: 0.0.40
codegen_flags: <defaults>
</compile_context>

<pallas_src>
import jax
import jax.numpy as jnp
from jax.experimental import pallas as pl
from jax.experimental.pallas import tpu as pltpu

# ---- hyperparameters implied by the module -------------------------------
EMBEDDING_SIZE = 32               # embeddingSize
CHANNELS = 4                      # input_size[0]
TIMESTAMPS = 8                    # sequence length
LAYERS = 2                        # nn.LSTM num_layers
BATCH = 2
D_IN = EMBEDDING_SIZE // 2        # lstm_dec1 input size
HID = EMBEDDING_SIZE              # lstm_dec1 hidden size


# ---- Pallas kernel --------------------------------------------------------
def _lstm_decoder_kernel(x_ref,                   # (T*B, D_IN)  time-major
                         wih0_ref, whh0_ref,      # (D_IN, 4H), (HID, 4H)
                         b0_ref,                  # (1, 4H)
                         w1_ref, b1_ref,          # (2*HID, 4H), (1, 4H)
                         wlin_ref, blin_ref,      # (HID, C), (1, C)
                         dec_ref,                 # out: (T*B, C) time-major
                         hid_ref,                 # out: (LAYERS*B, HID)
                         h1_scr):                 # scratch: (T*B, HID)
    """Whole sequence in one invocation; everything is VMEM-resident."""
    TB, C = dec_ref.shape
    H = hid_ref.shape[-1]
    B = hid_ref.shape[0] // LAYERS
    T = TB // B

    # ---- hoist all weight / bias reads out of the time loop ---------------
    wih0 = wih0_ref[...]
    whh0 = whh0_ref[...]
    b0 = b0_ref[...]
    w1 = w1_ref[...]
    b1 = b1_ref[...]
    wlin = wlin_ref[...]
    blin = blin_ref[...]

    # ---- layer-0 input projection for ALL timesteps, off the critical path
    #      (T*B, D_IN) @ (D_IN, 4H) + b0  -> (T*B, 4H)
    gates_x0 = jnp.dot(x_ref[...], wih0,
                       preferred_element_type=jnp.float32) + b0

    def activations(gates):
        # gate column layout: (i, f, o | g)  -> 2 contiguous EUP passes.
        s = jax.nn.sigmoid(gates[:, :3 * H])
        i = s[:, 0 * H:1 * H]
        f = s[:, 1 * H:2 * H]
        o = s[:, 2 * H:3 * H]
        g = jnp.tanh(gates[:, 3 * H:4 * H])
        return i, f, o, g

    zeros = jnp.zeros((B, H), jnp.float32)
    h0, c0, h1, c1 = zeros, zeros, zeros, zeros

    # Time loop: fully unrolled at trace time (T static) -> static slices.
    for t in range(T):
        # ---- layer 0: recurrent-only matmul (K = HID) ----------------------
        gates0 = jnp.dot(h0, whh0,
                         preferred_element_type=jnp.float32) \
            + gates_x0[t * B:(t + 1) * B, :]
        i0, f0, o0, g0 = activations(gates0)
        c0 = f0 * c0 + i0 * g0
        h0 = o0 * jnp.tanh(c0)

        # ---- layer 1: fused [h0, h1] @ [W_ih1; W_hh1] ----------------------
        zh = jnp.concatenate([h0, h1], axis=1)
        gates1 = jnp.dot(zh, w1, preferred_element_type=jnp.float32) + b1
        i1, f1, o1, g1 = activations(gates1)
        c1 = f1 * c1 + i1 * g1
        h1 = o1 * jnp.tanh(c1)

        # one contiguous (B, HID) store per step, time-major rows.
        h1_scr[t * B:(t + 1) * B, :] = h1

    # final hidden state h_n as ONE stacked (LAYERS*B, HID) store.
    hid_ref[...] = jnp.concatenate([h0, h1], axis=0)

    # Linear(HID -> CHANNELS) + sigmoid over ALL timesteps, one matmul,
    # one lane-dense slab store.
    dec_ref[...] = jax.nn.sigmoid(
        jnp.dot(h1_scr[...], wlin, preferred_element_type=jnp.float32) + blin)


# ---- wrapper --------------------------------------------------------------
@jax.jit
def lstm_decoder_forward(x_btd, params):
    """x_btd: (B, T, D_IN) float32.  Returns (dec_out (B,T,C), hidden (L,B,H))."""
    (wih0, whh0, b0, w1, b1, wlin, blin) = params
    B, T, Din = x_btd.shape
    # tiny time-major flatten so per-step slices inside the kernel are
    # contiguous sublane blocks.
    x_tb = jnp.transpose(x_btd, (1, 0, 2)).reshape(T * B, Din)

    dec_slab, hid_slab = pl.pallas_call(
        _lstm_decoder_kernel,
        out_shape=(jax.ShapeDtypeStruct((T * B, CHANNELS), jnp.float32),
                   jax.ShapeDtypeStruct((LAYERS * B, HID), jnp.float32)),
        # no grid: whole problem (~100 KiB) fits in VMEM as single blocks.
        scratch_shapes=[pltpu.VMEM((T * B, HID), jnp.float32)],
    )(x_tb, wih0, whh0, b0, w1, b1, wlin, blin)

    dec = jnp.transpose(dec_slab.reshape(T, B, CHANNELS), (1, 0, 2))
    hidden = hid_slab.reshape(LAYERS, B, HID)
    return dec, hidden


# ---- deterministic parameter init (PyTorch-style uniform) ------------------
# NOTE: gate columns are laid out (i, f, o, g); PyTorch-exported (i, f, g, o)
# weights would need a column permutation before use.
def init_params(key):
    k_lstm = 1.0 / jnp.sqrt(HID)
    k_lin = 1.0 / jnp.sqrt(EMBEDDING_SIZE)
    keys = jax.random.split(key, 10)

    def u(k, shape, bound):
        return jax.random.uniform(k, shape, jnp.float32, -bound, bound)

    # layer 0 (already transposed so the kernel does x @ W / h @ W directly)
    wih0 = u(keys[0], (D_IN, 4 * HID), k_lstm)
    whh0 = u(keys[1], (HID, 4 * HID), k_lstm)
    b0 = u(keys[2], (1, 4 * HID), k_lstm) + u(keys[3], (1, 4 * HID), k_lstm)
    # layer 1
    wih1 = u(keys[4], (HID, 4 * HID), k_lstm)
    whh1 = u(keys[5], (HID, 4 * HID), k_lstm)
    b1 = u(keys[6], (1, 4 * HID), k_lstm) + u(keys[7], (1, 4 * HID), k_lstm)
    # linear
    wlin = u(keys[8], (HID, CHANNELS), k_lin)
    blin = u(keys[9], (1, CHANNELS), k_lin)

    # fused [W_ih1; W_hh1] stack for the layer-1 single-dot cell
    w1 = jnp.concatenate([wih1, whh1], axis=0)   # (2*HID, 4H)
    return (wih0, whh0, b0, w1, b1, wlin, blin)


# ---- pure-JAX reference for correctness check ------------------------------
def _ref_forward(x_btd, params):
    (wih0, whh0, b0, w1, b1, wlin, blin) = params

    def lstm_layer(x_tbd, wih, whh, b):
        B = x_tbd.shape[1]

        def step(carry, x_t):
            h, c = carry
            gates = x_t @ wih + h @ whh + b
            i = jax.nn.sigmoid(gates[:, 0 * HID:1 * HID])
            f = jax.nn.sigmoid(gates[:, 1 * HID:2 * HID])
            o = jax.nn.sigmoid(gates[:, 2 * HID:3 * HID])
            g = jnp.tanh(gates[:, 3 * HID:4 * HID])
            c_new = f * c + i * g
            h_new = o * jnp.tanh(c_new)
            return (h_new, c_new), h_new

        init = (jnp.zeros((B, HID), jnp.float32),
                jnp.zeros((B, HID), jnp.float32))
        (h_last, _), outs = jax.lax.scan(step, init, x_tbd)
        return outs, h_last

    x_tbd = jnp.transpose(x_btd, (1, 0, 2))
    out0, h0 = lstm_layer(x_tbd, wih0, whh0, b0)
    out1, h1 = lstm_layer(out0, w1[:HID], w1[HID:], b1)
    dec = jax.nn.sigmoid(out1 @ wlin + blin)             # (T, B, C)
    return jnp.transpose(dec, (1, 0, 2)), jnp.stack([h0, h1], axis=0)


if __name__ == "__main__":
    key = jax.random.PRNGKey(0)
    pkey, xkey = jax.random.split(key)
    params = init_params(pkey)
    x = jax.random.normal(xkey, (BATCH, TIMESTAMPS, D_IN), jnp.float32)

    dec_out, hidden = jax.block_until_ready(lstm_decoder_forward(x, params))
    ref_dec, ref_hidden = _ref_forward(x, params)

    assert dec_out.shape == (BATCH, TIMESTAMPS, CHANNELS)
    assert hidden.shape == (LAYERS, BATCH, HID)
    assert jnp.allclose(dec_out, ref_dec, atol=1e-5, rtol=1e-5)
    assert jnp.allclose(hidden, ref_hidden, atol=1e-5, rtol=1e-5)

    print("KERNEL_OK")
</pallas_src>

<mosaic_0001>
module attributes {stable_mosaic.version = 11 : i64} {
  func.func @_lstm_decoder_kernel(%arg0: memref<16x16xf32, #tpu.memory_space<vmem>>, %arg1: memref<16x128xf32, #tpu.memory_space<vmem>>, %arg2: memref<32x128xf32, #tpu.memory_space<vmem>>, %arg3: memref<1x128xf32, #tpu.memory_space<vmem>>, %arg4: memref<64x128xf32, #tpu.memory_space<vmem>>, %arg5: memref<1x128xf32, #tpu.memory_space<vmem>>, %arg6: memref<32x4xf32, #tpu.memory_space<vmem>>, %arg7: memref<1x4xf32, #tpu.memory_space<vmem>>, %arg8: memref<16x4xf32, #tpu.memory_space<vmem>>, %arg9: memref<4x32xf32, #tpu.memory_space<vmem>>, %arg10: memref<16x32xf32, #tpu.memory_space<vmem>>) attributes {dimension_semantics = [], scalar_prefetch = 0 : i64, scratch_operands = 1 : i64, tpu.core_type = #tpu.core_type<tc>} {
    %c0 = arith.constant 0 : index
    %c0_0 = arith.constant 0 : index
    %0 = vector.load %arg1[%c0, %c0_0] : memref<16x128xf32, #tpu.memory_space<vmem>>, vector<16x128xf32>
    %c0_1 = arith.constant 0 : index
    %c0_2 = arith.constant 0 : index
    %1 = vector.load %arg2[%c0_1, %c0_2] : memref<32x128xf32, #tpu.memory_space<vmem>>, vector<32x128xf32>
    %c0_3 = arith.constant 0 : index
    %c0_4 = arith.constant 0 : index
    %2 = vector.load %arg3[%c0_3, %c0_4] : memref<1x128xf32, #tpu.memory_space<vmem>>, vector<1x128xf32>
    %c0_5 = arith.constant 0 : index
    %c0_6 = arith.constant 0 : index
    %3 = vector.load %arg4[%c0_5, %c0_6] : memref<64x128xf32, #tpu.memory_space<vmem>>, vector<64x128xf32>
    %c0_7 = arith.constant 0 : index
    %c0_8 = arith.constant 0 : index
    %4 = vector.load %arg5[%c0_7, %c0_8] : memref<1x128xf32, #tpu.memory_space<vmem>>, vector<1x128xf32>
    %c0_9 = arith.constant 0 : index
    %c0_10 = arith.constant 0 : index
    %5 = vector.load %arg6[%c0_9, %c0_10] : memref<32x4xf32, #tpu.memory_space<vmem>>, vector<32x4xf32>
    %c0_11 = arith.constant 0 : index
    %c0_12 = arith.constant 0 : index
    %6 = vector.load %arg7[%c0_11, %c0_12] : memref<1x4xf32, #tpu.memory_space<vmem>>, vector<1x4xf32>
    %c0_13 = arith.constant 0 : index
    %c0_14 = arith.constant 0 : index
    %7 = vector.load %arg0[%c0_13, %c0_14] : memref<16x16xf32, #tpu.memory_space<vmem>>, vector<16x16xf32>
    %cst = arith.constant dense<0.000000e+00> : vector<16x128xf32>
    %8 = tpu.matmul %7, %0, %cst {dimension_numbers = #tpu.dot_dimension_numbers<[1], [0], [0], [1], [0, 0, 1, 1], [], []>} : vector<16x16xf32>, vector<16x128xf32>, vector<16x128xf32> -> vector<16x128xf32>
    %9 = vector.broadcast %2 : vector<1x128xf32> to vector<16x128xf32>
    %10 = arith.addf %8, %9 : vector<16x128xf32>
    %cst_15 = arith.constant 0.000000e+00 : f32
    %11 = vector.broadcast %cst_15 : f32 to vector<2x32xf32>
    %cst_16 = arith.constant dense<0.000000e+00> : vector<2x128xf32>
    %12 = tpu.matmul %11, %1, %cst_16 {dimension_numbers = #tpu.dot_dimension_numbers<[1], [0], [0], [1], [0, 0, 1, 1], [], []>} : vector<2x32xf32>, vector<32x128xf32>, vector<2x128xf32> -> vector<2x128xf32>
    %13 = vector.extract_strided_slice %10 {offsets = [0, 0], sizes = [2, 128], strides = [1, 1]} : vector<16x128xf32> to vector<2x128xf32>
    %14 = arith.addf %12, %13 : vector<2x128xf32>
    %15 = vector.extract_strided_slice %14 {offsets = [0, 0], sizes = [2, 96], strides = [1, 1]} : vector<2x128xf32> to vector<2x96xf32>
    %16 = arith.negf %15 : vector<2x96xf32>
    %17 = math.exp %16 : vector<2x96xf32>
    %cst_17 = arith.constant 1.000000e+00 : f32
    %18 = vector.broadcast %cst_17 : f32 to vector<2x96xf32>
    %19 = arith.addf %18, %17 : vector<2x96xf32>
    %20 = arith.divf %18, %19 : vector<2x96xf32>
    %21 = vector.extract_strided_slice %20 {offsets = [0, 0], sizes = [2, 32], strides = [1, 1]} : vector<2x96xf32> to vector<2x32xf32>
    %22 = vector.extract_strided_slice %20 {offsets = [0, 32], sizes = [2, 32], strides = [1, 1]} : vector<2x96xf32> to vector<2x32xf32>
    %23 = vector.extract_strided_slice %20 {offsets = [0, 64], sizes = [2, 32], strides = [1, 1]} : vector<2x96xf32> to vector<2x32xf32>
    %24 = vector.extract_strided_slice %14 {offsets = [0, 96], sizes = [2, 32], strides = [1, 1]} : vector<2x128xf32> to vector<2x32xf32>
    %25 = math.tanh %24 : vector<2x32xf32>
    %26 = arith.mulf %22, %11 : vector<2x32xf32>
    %27 = arith.mulf %21, %25 : vector<2x32xf32>
    %28 = arith.addf %26, %27 : vector<2x32xf32>
    %29 = math.tanh %28 : vector<2x32xf32>
    %30 = arith.mulf %23, %29 : vector<2x32xf32>
    %31 = tpu.concatenate %30, %11 in 1 : vector<2x32xf32>, vector<2x32xf32> -> vector<2x64xf32>
    %cst_18 = arith.constant dense<0.000000e+00> : vector<2x128xf32>
    %32 = tpu.matmul %31, %3, %cst_18 {dimension_numbers = #tpu.dot_dimension_numbers<[1], [0], [0], [1], [0, 0, 1, 1], [], []>} : vector<2x64xf32>, vector<64x128xf32>, vector<2x128xf32> -> vector<2x128xf32>
    %33 = vector.broadcast %4 : vector<1x128xf32> to vector<2x128xf32>
    %34 = arith.addf %32, %33 : vector<2x128xf32>
    %35 = vector.extract_strided_slice %34 {offsets = [0, 0], sizes = [2, 96], strides = [1, 1]} : vector<2x128xf32> to vector<2x96xf32>
    %36 = arith.negf %35 : vector<2x96xf32>
    %37 = math.exp %36 : vector<2x96xf32>
    %cst_19 = arith.constant 1.000000e+00 : f32
    %38 = vector.broadcast %cst_19 : f32 to vector<2x96xf32>
    %39 = arith.addf %38, %37 : vector<2x96xf32>
    %40 = arith.divf %38, %39 : vector<2x96xf32>
    %41 = vector.extract_strided_slice %40 {offsets = [0, 0], sizes = [2, 32], strides = [1, 1]} : vector<2x96xf32> to vector<2x32xf32>
    %42 = vector.extract_strided_slice %40 {offsets = [0, 32], sizes = [2, 32], strides = [1, 1]} : vector<2x96xf32> to vector<2x32xf32>
    %43 = vector.extract_strided_slice %40 {offsets = [0, 64], sizes = [2, 32], strides = [1, 1]} : vector<2x96xf32> to vector<2x32xf32>
    %44 = vector.extract_strided_slice %34 {offsets = [0, 96], sizes = [2, 32], strides = [1, 1]} : vector<2x128xf32> to vector<2x32xf32>
    %45 = math.tanh %44 : vector<2x32xf32>
    %46 = arith.mulf %42, %11 : vector<2x32xf32>
    %47 = arith.mulf %41, %45 : vector<2x32xf32>
    %48 = arith.addf %46, %47 : vector<2x32xf32>
    %49 = math.tanh %48 : vector<2x32xf32>
    %50 = arith.mulf %43, %49 : vector<2x32xf32>
    %c0_20 = arith.constant 0 : index
    %c0_21 = arith.constant 0 : index
    %51 = vector.load %arg10[%c0_20, %c0_21] : memref<16x32xf32, #tpu.memory_space<vmem>>, vector<2x32xf32>
    tpu.vector_store %arg10[%c0_20, %c0_21], %50 {strides = array<i32>} : memref<16x32xf32, #tpu.memory_space<vmem>>, vector<2x32xf32>,
    %cst_22 = arith.constant dense<0.000000e+00> : vector<2x128xf32>
    %52 = tpu.matmul %30, %1, %cst_22 {dimension_numbers = #tpu.dot_dimension_numbers<[1], [0], [0], [1], [0, 0, 1, 1], [], []>} : vector<2x32xf32>, vector<32x128xf32>, vector<2x128xf32> -> vector<2x128xf32>
    %53 = vector.extract_strided_slice %10 {offsets = [2, 0], sizes = [2, 128], strides = [1, 1]} : vector<16x128xf32> to vector<2x128xf32>
    %54 = arith.addf %52, %53 : vector<2x128xf32>
    %55 = vector.extract_strided_slice %54 {offsets = [0, 0], sizes = [2, 96], strides = [1, 1]} : vector<2x128xf32> to vector<2x96xf32>
    %56 = arith.negf %55 : vector<2x96xf32>
    %57 = math.exp %56 : vector<2x96xf32>
    %cst_23 = arith.constant 1.000000e+00 : f32
    %58 = vector.broadcast %cst_23 : f32 to vector<2x96xf32>
    %59 = arith.addf %58, %57 : vector<2x96xf32>
    %60 = arith.divf %58, %59 : vector<2x96xf32>
    %61 = vector.extract_strided_slice %60 {offsets = [0, 0], sizes = [2, 32], strides = [1, 1]} : vector<2x96xf32> to vector<2x32xf32>
    %62 = vector.extract_strided_slice %60 {offsets = [0, 32], sizes = [2, 32], strides = [1, 1]} : vector<2x96xf32> to vector<2x32xf32>
    %63 = vector.extract_strided_slice %60 {offsets = [0, 64], sizes = [2, 32], strides = [1, 1]} : vector<2x96xf32> to vector<2x32xf32>
    %64 = vector.extract_strided_slice %54 {offsets = [0, 96], sizes = [2, 32], strides = [1, 1]} : vector<2x128xf32> to vector<2x32xf32>
    %65 = math.tanh %64 : vector<2x32xf32>
    %66 = arith.mulf %62, %28 : vector<2x32xf32>
    %67 = arith.mulf %61, %65 : vector<2x32xf32>
    %68 = arith.addf %66, %67 : vector<2x32xf32>
    %69 = math.tanh %68 : vector<2x32xf32>
    %70 = arith.mulf %63, %69 : vector<2x32xf32>
    %71 = tpu.concatenate %70, %50 in 1 : vector<2x32xf32>, vector<2x32xf32> -> vector<2x64xf32>
    %cst_24 = arith.constant dense<0.000000e+00> : vector<2x128xf32>
    %72 = tpu.matmul %71, %3, %cst_24 {dimension_numbers = #tpu.dot_dimension_numbers<[1], [0], [0], [1], [0, 0, 1, 1], [], []>} : vector<2x64xf32>, vector<64x128xf32>, vector<2x128xf32> -> vector<2x128xf32>
    %73 = vector.broadcast %4 : vector<1x128xf32> to vector<2x128xf32>
    %74 = arith.addf %72, %73 : vector<2x128xf32>
    %75 = vector.extract_strided_slice %74 {offsets = [0, 0], sizes = [2, 96], strides = [1, 1]} : vector<2x128xf32> to vector<2x96xf32>
    %76 = arith.negf %75 : vector<2x96xf32>
    %77 = math.exp %76 : vector<2x96xf32>
    %cst_25 = arith.constant 1.000000e+00 : f32
    %78 = vector.broadcast %cst_25 : f32 to vector<2x96xf32>
    %79 = arith.addf %78, %77 : vector<2x96xf32>
    %80 = arith.divf %78, %79 : vector<2x96xf32>
    %81 = vector.extract_strided_slice %80 {offsets = [0, 0], sizes = [2, 32], strides = [1, 1]} : vector<2x96xf32> to vector<2x32xf32>
    %82 = vector.extract_strided_slice %80 {offsets = [0, 32], sizes = [2, 32], strides = [1, 1]} : vector<2x96xf32> to vector<2x32xf32>
    %83 = vector.extract_strided_slice %80 {offsets = [0, 64], sizes = [2, 32], strides = [1, 1]} : vector<2x96xf32> to vector<2x32xf32>
    %84 = vector.extract_strided_slice %74 {offsets = [0, 96], sizes = [2, 32], strides = [1, 1]} : vector<2x128xf32> to vector<2x32xf32>
    %85 = math.tanh %84 : vector<2x32xf32>
    %86 = arith.mulf %82, %48 : vector<2x32xf32>
    %87 = arith.mulf %81, %85 : vector<2x32xf32>
    %88 = arith.addf %86, %87 : vector<2x32xf32>
    %89 = math.tanh %88 : vector<2x32xf32>
    %90 = arith.mulf %83, %89 : vector<2x32xf32>
    %c2 = arith.constant 2 : index
    %c0_26 = arith.constant 0 : index
    %91 = vector.load %arg10[%c2, %c0_26] : memref<16x32xf32, #tpu.memory_space<vmem>>, vector<2x32xf32>
    tpu.vector_store %arg10[%c2, %c0_26], %90 {strides = array<i32>} : memref<16x32xf32, #tpu.memory_space<vmem>>, vector<2x32xf32>,
    %cst_27 = arith.constant dense<0.000000e+00> : vector<2x128xf32>
    %92 = tpu.matmul %70, %1, %cst_27 {dimension_numbers = #tpu.dot_dimension_numbers<[1], [0], [0], [1], [0, 0, 1, 1], [], []>} : vector<2x32xf32>, vector<32x128xf32>, vector<2x128xf32> -> vector<2x128xf32>
    %93 = vector.extract_strided_slice %10 {offsets = [4, 0], sizes = [2, 128], strides = [1, 1]} : vector<16x128xf32> to vector<2x128xf32>
    %94 = arith.addf %92, %93 : vector<2x128xf32>
    %95 = vector.extract_strided_slice %94 {offsets = [0, 0], sizes = [2, 96], strides = [1, 1]} : vector<2x128xf32> to vector<2x96xf32>
    %96 = arith.negf %95 : vector<2x96xf32>
    %97 = math.exp %96 : vector<2x96xf32>
    %cst_28 = arith.constant 1.000000e+00 : f32
    %98 = vector.broadcast %cst_28 : f32 to vector<2x96xf32>
    %99 = arith.addf %98, %97 : vector<2x96xf32>
    %100 = arith.divf %98, %99 : vector<2x96xf32>
    %101 = vector.extract_strided_slice %100 {offsets = [0, 0], sizes = [2, 32], strides = [1, 1]} : vector<2x96xf32> to vector<2x32xf32>
    %102 = vector.extract_strided_slice %100 {offsets = [0, 32], sizes = [2, 32], strides = [1, 1]} : vector<2x96xf32> to vector<2x32xf32>
    %103 = vector.extract_strided_slice %100 {offsets = [0, 64], sizes = [2, 32], strides = [1, 1]} : vector<2x96xf32> to vector<2x32xf32>
    %104 = vector.extract_strided_slice %94 {offsets = [0, 96], sizes = [2, 32], strides = [1, 1]} : vector<2x128xf32> to vector<2x32xf32>
    %105 = math.tanh %104 : vector<2x32xf32>
    %106 = arith.mulf %102, %68 : vector<2x32xf32>
    %107 = arith.mulf %101, %105 : vector<2x32xf32>
    %108 = arith.addf %106, %107 : vector<2x32xf32>
    %109 = math.tanh %108 : vector<2x32xf32>
    %110 = arith.mulf %103, %109 : vector<2x32xf32>
    %111 = tpu.concatenate %110, %90 in 1 : vector<2x32xf32>, vector<2x32xf32> -> vector<2x64xf32>
    %cst_29 = arith.constant dense<0.000000e+00> : vector<2x128xf32>
    %112 = tpu.matmul %111, %3, %cst_29 {dimension_numbers = #tpu.dot_dimension_numbers<[1], [0], [0], [1], [0, 0, 1, 1], [], []>} : vector<2x64xf32>, vector<64x128xf32>, vector<2x128xf32> -> vector<2x128xf32>
    %113 = vector.broadcast %4 : vector<1x128xf32> to vector<2x128xf32>
    %114 = arith.addf %112, %113 : vector<2x128xf32>
    %115 = vector.extract_strided_slice %114 {offsets = [0, 0], sizes = [2, 96], strides = [1, 1]} : vector<2x128xf32> to vector<2x96xf32>
    %116 = arith.negf %115 : vector<2x96xf32>
    %117 = math.exp %116 : vector<2x96xf32>
    %cst_30 = arith.constant 1.000000e+00 : f32
    %118 = vector.broadcast %cst_30 : f32 to vector<2x96xf32>
    %119 = arith.addf %118, %117 : vector<2x96xf32>
    %120 = arith.divf %118, %119 : vector<2x96xf32>
    %121 = vector.extract_strided_slice %120 {offsets = [0, 0], sizes = [2, 32], strides = [1, 1]} : vector<2x96xf32> to vector<2x32xf32>
    %122 = vector.extract_strided_slice %120 {offsets = [0, 32], sizes = [2, 32], strides = [1, 1]} : vector<2x96xf32> to vector<2x32xf32>
    %123 = vector.extract_strided_slice %120 {offsets = [0, 64], sizes = [2, 32], strides = [1, 1]} : vector<2x96xf32> to vector<2x32xf32>
    %124 = vector.extract_strided_slice %114 {offsets = [0, 96], sizes = [2, 32], strides = [1, 1]} : vector<2x128xf32> to vector<2x32xf32>
    %125 = math.tanh %124 : vector<2x32xf32>
    %126 = arith.mulf %122, %88 : vector<2x32xf32>
    %127 = arith.mulf %121, %125 : vector<2x32xf32>
    %128 = arith.addf %126, %127 : vector<2x32xf32>
    %129 = math.tanh %128 : vector<2x32xf32>
    %130 = arith.mulf %123, %129 : vector<2x32xf32>
    %c4 = arith.constant 4 : index
    %c0_31 = arith.constant 0 : index
    %131 = vector.load %arg10[%c4, %c0_31] : memref<16x32xf32, #tpu.memory_space<vmem>>, vector<2x32xf32>
    tpu.vector_store %arg10[%c4, %c0_31], %130 {strides = array<i32>} : memref<16x32xf32, #tpu.memory_space<vmem>>, vector<2x32xf32>,
    %cst_32 = arith.constant dense<0.000000e+00> : vector<2x128xf32>
    %132 = tpu.matmul %110, %1, %cst_32 {dimension_numbers = #tpu.dot_dimension_numbers<[1], [0], [0], [1], [0, 0, 1, 1], [], []>} : vector<2x32xf32>, vector<32x128xf32>, vector<2x128xf32> -> vector<2x128xf32>
    %133 = vector.extract_strided_slice %10 {offsets = [6, 0], sizes = [2, 128], strides = [1, 1]} : vector<16x128xf32> to vector<2x128xf32>
    %134 = arith.addf %132, %133 : vector<2x128xf32>
    %135 = vector.extract_strided_slice %134 {offsets = [0, 0], sizes = [2, 96], strides = [1, 1]} : vector<2x128xf32> to vector<2x96xf32>
    %136 = arith.negf %135 : vector<2x96xf32>
    %137 = math.exp %136 : vector<2x96xf32>
    %cst_33 = arith.constant 1.000000e+00 : f32
    %138 = vector.broadcast %cst_33 : f32 to vector<2x96xf32>
    %139 = arith.addf %138, %137 : vector<2x96xf32>
    %140 = arith.divf %138, %139 : vector<2x96xf32>
    %141 = vector.extract_strided_slice %140 {offsets = [0, 0], sizes = [2, 32], strides = [1, 1]} : vector<2x96xf32> to vector<2x32xf32>
    %142 = vector.extract_strided_slice %140 {offsets = [0, 32], sizes = [2, 32], strides = [1, 1]} : vector<2x96xf32> to vector<2x32xf32>
    %143 = vector.extract_strided_slice %140 {offsets = [0, 64], sizes = [2, 32], strides = [1, 1]} : vector<2x96xf32> to vector<2x32xf32>
    %144 = vector.extract_strided_slice %134 {offsets = [0, 96], sizes = [2, 32], strides = [1, 1]} : vector<2x128xf32> to vector<2x32xf32>
    %145 = math.tanh %144 : vector<2x32xf32>
    %146 = arith.mulf %142, %108 : vector<2x32xf32>
    %147 = arith.mulf %141, %145 : vector<2x32xf32>
    %148 = arith.addf %146, %147 : vector<2x32xf32>
    %149 = math.tanh %148 : vector<2x32xf32>
    %150 = arith.mulf %143, %149 : vector<2x32xf32>
    %151 = tpu.concatenate %150, %130 in 1 : vector<2x32xf32>, vector<2x32xf32> -> vector<2x64xf32>
    %cst_34 = arith.constant dense<0.000000e+00> : vector<2x128xf32>
    %152 = tpu.matmul %151, %3, %cst_34 {dimension_numbers = #tpu.dot_dimension_numbers<[1], [0], [0], [1], [0, 0, 1, 1], [], []>} : vector<2x64xf32>, vector<64x128xf32>, vector<2x128xf32> -> vector<2x128xf32>
    %153 = vector.broadcast %4 : vector<1x128xf32> to vector<2x128xf32>
    %154 = arith.addf %152, %153 : vector<2x128xf32>
    %155 = vector.extract_strided_slice %154 {offsets = [0, 0], sizes = [2, 96], strides = [1, 1]} : vector<2x128xf32> to vector<2x96xf32>
    %156 = arith.negf %155 : vector<2x96xf32>
    %157 = math.exp %156 : vector<2x96xf32>
    %cst_35 = arith.constant 1.000000e+00 : f32
    %158 = vector.broadcast %cst_35 : f32 to vector<2x96xf32>
    %159 = arith.addf %158, %157 : vector<2x96xf32>
    %160 = arith.divf %158, %159 : vector<2x96xf32>
    %161 = vector.extract_strided_slice %160 {offsets = [0, 0], sizes = [2, 32], strides = [1, 1]} : vector<2x96xf32> to vector<2x32xf32>
    %162 = vector.extract_strided_slice %160 {offsets = [0, 32], sizes = [2, 32], strides = [1, 1]} : vector<2x96xf32> to vector<2x32xf32>
    %163 = vector.extract_strided_slice %160 {offsets = [0, 64], sizes = [2, 32], strides = [1, 1]} : vector<2x96xf32> to vector<2x32xf32>
    %164 = vector.extract_strided_slice %154 {offsets = [0, 96], sizes = [2, 32], strides = [1, 1]} : vector<2x128xf32> to vector<2x32xf32>
    %165 = math.tanh %164 : vector<2x32xf32>
    %166 = arith.mulf %162, %128 : vector<2x32xf32>
    %167 = arith.mulf %161, %165 : vector<2x32xf32>
    %168 = arith.addf %166, %167 : vector<2x32xf32>
    %169 = math.tanh %168 : vector<2x32xf32>
    %170 = arith.mulf %163, %169 : vector<2x32xf32>
    %c6 = arith.constant 6 : index
    %c0_36 = arith.constant 0 : index
    %171 = vector.load %arg10[%c6, %c0_36] : memref<16x32xf32, #tpu.memory_space<vmem>>, vector<2x32xf32>
    tpu.vector_store %arg10[%c6, %c0_36], %170 {strides = array<i32>} : memref<16x32xf32, #tpu.memory_space<vmem>>, vector<2x32xf32>,
    %cst_37 = arith.constant dense<0.000000e+00> : vector<2x128xf32>
    %172 = tpu.matmul %150, %1, %cst_37 {dimension_numbers = #tpu.dot_dimension_numbers<[1], [0], [0], [1], [0, 0, 1, 1], [], []>} : vector<2x32xf32>, vector<32x128xf32>, vector<2x128xf32> -> vector<2x128xf32>
    %173 = vector.extract_strided_slice %10 {offsets = [8, 0], sizes = [2, 128], strides = [1, 1]} : vector<16x128xf32> to vector<2x128xf32>
    %174 = arith.addf %172, %173 : vector<2x128xf32>
    %175 = vector.extract_strided_slice %174 {offsets = [0, 0], sizes = [2, 96], strides = [1, 1]} : vector<2x128xf32> to vector<2x96xf32>
    %176 = arith.negf %175 : vector<2x96xf32>
    %177 = math.exp %176 : vector<2x96xf32>
    %cst_38 = arith.constant 1.000000e+00 : f32
    %178 = vector.broadcast %cst_38 : f32 to vector<2x96xf32>
    %179 = arith.addf %178, %177 : vector<2x96xf32>
    %180 = arith.divf %178, %179 : vector<2x96xf32>
    %181 = vector.extract_strided_slice %180 {offsets = [0, 0], sizes = [2, 32], strides = [1, 1]} : vector<2x96xf32> to vector<2x32xf32>
    %182 = vector.extract_strided_slice %180 {offsets = [0, 32], sizes = [2, 32], strides = [1, 1]} : vector<2x96xf32> to vector<2x32xf32>
    %183 = vector.extract_strided_slice %180 {offsets = [0, 64], sizes = [2, 32], strides = [1, 1]} : vector<2x96xf32> to vector<2x32xf32>
    %184 = vector.extract_strided_slice %174 {offsets = [0, 96], sizes = [2, 32], strides = [1, 1]} : vector<2x128xf32> to vector<2x32xf32>
    %185 = math.tanh %184 : vector<2x32xf32>
    %186 = arith.mulf %182, %148 : vector<2x32xf32>
    %187 = arith.mulf %181, %185 : vector<2x32xf32>
    %188 = arith.addf %186, %187 : vector<2x32xf32>
    %189 = math.tanh %188 : vector<2x32xf32>
    %190 = arith.mulf %183, %189 : vector<2x32xf32>
    %191 = tpu.concatenate %190, %170 in 1 : vector<2x32xf32>, vector<2x32xf32> -> vector<2x64xf32>
    %cst_39 = arith.constant dense<0.000000e+00> : vector<2x128xf32>
    %192 = tpu.matmul %191, %3, %cst_39 {dimension_numbers = #tpu.dot_dimension_numbers<[1], [0], [0], [1], [0, 0, 1, 1], [], []>} : vector<2x64xf32>, vector<64x128xf32>, vector<2x128xf32> -> vector<2x128xf32>
    %193 = vector.broadcast %4 : vector<1x128xf32> to vector<2x128xf32>
    %194 = arith.addf %192, %193 : vector<2x128xf32>
    %195 = vector.extract_strided_slice %194 {offsets = [0, 0], sizes = [2, 96], strides = [1, 1]} : vector<2x128xf32> to vector<2x96xf32>
    %196 = arith.negf %195 : vector<2x96xf32>
    %197 = math.exp %196 : vector<2x96xf32>
    %cst_40 = arith.constant 1.000000e+00 : f32
    %198 = vector.broadcast %cst_40 : f32 to vector<2x96xf32>
    %199 = arith.addf %198, %197 : vector<2x96xf32>
    %200 = arith.divf %198, %199 : vector<2x96xf32>
    %201 = vector.extract_strided_slice %200 {offsets = [0, 0], sizes = [2, 32], strides = [1, 1]} : vector<2x96xf32> to vector<2x32xf32>
    %202 = vector.extract_strided_slice %200 {offsets = [0, 32], sizes = [2, 32], strides = [1, 1]} : vector<2x96xf32> to vector<2x32xf32>
    %203 = vector.extract_strided_slice %200 {offsets = [0, 64], sizes = [2, 32], strides = [1, 1]} : vector<2x96xf32> to vector<2x32xf32>
    %204 = vector.extract_strided_slice %194 {offsets = [0, 96], sizes = [2, 32], strides = [1, 1]} : vector<2x128xf32> to vector<2x32xf32>
    %205 = math.tanh %204 : vector<2x32xf32>
    %206 = arith.mulf %202, %168 : vector<2x32xf32>
    %207 = arith.mulf %201, %205 : vector<2x32xf32>
    %208 = arith.addf %206, %207 : vector<2x32xf32>
    %209 = math.tanh %208 : vector<2x32xf32>
    %210 = arith.mulf %203, %209 : vector<2x32xf32>
    %c8 = arith.constant 8 : index
    %c0_41 = arith.constant 0 : index
    %211 = vector.load %arg10[%c8, %c0_41] : memref<16x32xf32, #tpu.memory_space<vmem>>, vector<2x32xf32>
    tpu.vector_store %arg10[%c8, %c0_41], %210 {strides = array<i32>} : memref<16x32xf32, #tpu.memory_space<vmem>>, vector<2x32xf32>,
    %cst_42 = arith.constant dense<0.000000e+00> : vector<2x128xf32>
    %212 = tpu.matmul %190, %1, %cst_42 {dimension_numbers = #tpu.dot_dimension_numbers<[1], [0], [0], [1], [0, 0, 1, 1], [], []>} : vector<2x32xf32>, vector<32x128xf32>, vector<2x128xf32> -> vector<2x128xf32>
    %213 = vector.extract_strided_slice %10 {offsets = [10, 0], sizes = [2, 128], strides = [1, 1]} : vector<16x128xf32> to vector<2x128xf32>
    %214 = arith.addf %212, %213 : vector<2x128xf32>
    %215 = vector.extract_strided_slice %214 {offsets = [0, 0], sizes = [2, 96], strides = [1, 1]} : vector<2x128xf32> to vector<2x96xf32>
    %216 = arith.negf %215 : vector<2x96xf32>
    %217 = math.exp %216 : vector<2x96xf32>
    %cst_43 = arith.constant 1.000000e+00 : f32
    %218 = vector.broadcast %cst_43 : f32 to vector<2x96xf32>
    %219 = arith.addf %218, %217 : vector<2x96xf32>
    %220 = arith.divf %218, %219 : vector<2x96xf32>
    %221 = vector.extract_strided_slice %220 {offsets = [0, 0], sizes = [2, 32], strides = [1, 1]} : vector<2x96xf32> to vector<2x32xf32>
    %222 = vector.extract_strided_slice %220 {offsets = [0, 32], sizes = [2, 32], strides = [1, 1]} : vector<2x96xf32> to vector<2x32xf32>
    %223 = vector.extract_strided_slice %220 {offsets = [0, 64], sizes = [2, 32], strides = [1, 1]} : vector<2x96xf32> to vector<2x32xf32>
    %224 = vector.extract_strided_slice %214 {offsets = [0, 96], sizes = [2, 32], strides = [1, 1]} : vector<2x128xf32> to vector<2x32xf32>
    %225 = math.tanh %224 : vector<2x32xf32>
    %226 = arith.mulf %222, %188 : vector<2x32xf32>
    %227 = arith.mulf %221, %225 : vector<2x32xf32>
    %228 = arith.addf %226, %227 : vector<2x32xf32>
    %229 = math.tanh %228 : vector<2x32xf32>
    %230 = arith.mulf %223, %229 : vector<2x32xf32>
    %231 = tpu.concatenate %230, %210 in 1 : vector<2x32xf32>, vector<2x32xf32> -> vector<2x64xf32>
    %cst_44 = arith.constant dense<0.000000e+00> : vector<2x128xf32>
    %232 = tpu.matmul %231, %3, %cst_44 {dimension_numbers = #tpu.dot_dimension_numbers<[1], [0], [0], [1], [0, 0, 1, 1], [], []>} : vector<2x64xf32>, vector<64x128xf32>, vector<2x128xf32> -> vector<2x128xf32>
    %233 = vector.broadcast %4 : vector<1x128xf32> to vector<2x128xf32>
    %234 = arith.addf %232, %233 : vector<2x128xf32>
    %235 = vector.extract_strided_slice %234 {offsets = [0, 0], sizes = [2, 96], strides = [1, 1]} : vector<2x128xf32> to vector<2x96xf32>
    %236 = arith.negf %235 : vector<2x96xf32>
    %237 = math.exp %236 : vector<2x96xf32>
    %cst_45 = arith.constant 1.000000e+00 : f32
    %238 = vector.broadcast %cst_45 : f32 to vector<2x96xf32>
    %239 = arith.addf %238, %237 : vector<2x96xf32>
    %240 = arith.divf %238, %239 : vector<2x96xf32>
    %241 = vector.extract_strided_slice %240 {offsets = [0, 0], sizes = [2, 32], strides = [1, 1]} : vector<2x96xf32> to vector<2x32xf32>
    %242 = vector.extract_strided_slice %240 {offsets = [0, 32], sizes = [2, 32], strides = [1, 1]} : vector<2x96xf32> to vector<2x32xf32>
    %243 = vector.extract_strided_slice %240 {offsets = [0, 64], sizes = [2, 32], strides = [1, 1]} : vector<2x96xf32> to vector<2x32xf32>
    %244 = vector.extract_strided_slice %234 {offsets = [0, 96], sizes = [2, 32], strides = [1, 1]} : vector<2x128xf32> to vector<2x32xf32>
    %245 = math.tanh %244 : vector<2x32xf32>
    %246 = arith.mulf %242, %208 : vector<2x32xf32>
    %247 = arith.mulf %241, %245 : vector<2x32xf32>
    %248 = arith.addf %246, %247 : vector<2x32xf32>
    %249 = math.tanh %248 : vector<2x32xf32>
    %250 = arith.mulf %243, %249 : vector<2x32xf32>
    %c10 = arith.constant 10 : index
    %c0_46 = arith.constant 0 : index
    %251 = vector.load %arg10[%c10, %c0_46] : memref<16x32xf32, #tpu.memory_space<vmem>>, vector<2x32xf32>
    tpu.vector_store %arg10[%c10, %c0_46], %250 {strides = array<i32>} : memref<16x32xf32, #tpu.memory_space<vmem>>, vector<2x32xf32>,
    %cst_47 = arith.constant dense<0.000000e+00> : vector<2x128xf32>
    %252 = tpu.matmul %230, %1, %cst_47 {dimension_numbers = #tpu.dot_dimension_numbers<[1], [0], [0], [1], [0, 0, 1, 1], [], []>} : vector<2x32xf32>, vector<32x128xf32>, vector<2x128xf32> -> vector<2x128xf32>
    %253 = vector.extract_strided_slice %10 {offsets = [12, 0], sizes = [2, 128], strides = [1, 1]} : vector<16x128xf32> to vector<2x128xf32>
    %254 = arith.addf %252, %253 : vector<2x128xf32>
    %255 = vector.extract_strided_slice %254 {offsets = [0, 0], sizes = [2, 96], strides = [1, 1]} : vector<2x128xf32> to vector<2x96xf32>
    %256 = arith.negf %255 : vector<2x96xf32>
    %257 = math.exp %256 : vector<2x96xf32>
    %cst_48 = arith.constant 1.000000e+00 : f32
    %258 = vector.broadcast %cst_48 : f32 to vector<2x96xf32>
    %259 = arith.addf %258, %257 : vector<2x96xf32>
    %260 = arith.divf %258, %259 : vector<2x96xf32>
    %261 = vector.extract_strided_slice %260 {offsets = [0, 0], sizes = [2, 32], strides = [1, 1]} : vector<2x96xf32> to vector<2x32xf32>
    %262 = vector.extract_strided_slice %260 {offsets = [0, 32], sizes = [2, 32], strides = [1, 1]} : vector<2x96xf32> to vector<2x32xf32>
    %263 = vector.extract_strided_slice %260 {offsets = [0, 64], sizes = [2, 32], strides = [1, 1]} : vector<2x96xf32> to vector<2x32xf32>
    %264 = vector.extract_strided_slice %254 {offsets = [0, 96], sizes = [2, 32], strides = [1, 1]} : vector<2x128xf32> to vector<2x32xf32>
    %265 = math.tanh %264 : vector<2x32xf32>
    %266 = arith.mulf %262, %228 : vector<2x32xf32>
    %267 = arith.mulf %261, %265 : vector<2x32xf32>
    %268 = arith.addf %266, %267 : vector<2x32xf32>
    %269 = math.tanh %268 : vector<2x32xf32>
    %270 = arith.mulf %263, %269 : vector<2x32xf32>
    %271 = tpu.concatenate %270, %250 in 1 : vector<2x32xf32>, vector<2x32xf32> -> vector<2x64xf32>
    %cst_49 = arith.constant dense<0.000000e+00> : vector<2x128xf32>
    %272 = tpu.matmul %271, %3, %cst_49 {dimension_numbers = #tpu.dot_dimension_numbers<[1], [0], [0], [1], [0, 0, 1, 1], [], []>} : vector<2x64xf32>, vector<64x128xf32>, vector<2x128xf32> -> vector<2x128xf32>
    %273 = vector.broadcast %4 : vector<1x128xf32> to vector<2x128xf32>
    %274 = arith.addf %272, %273 : vector<2x128xf32>
    %275 = vector.extract_strided_slice %274 {offsets = [0, 0], sizes = [2, 96], strides = [1, 1]} : vector<2x128xf32> to vector<2x96xf32>
    %276 = arith.negf %275 : vector<2x96xf32>
    %277 = math.exp %276 : vector<2x96xf32>
    %cst_50 = arith.constant 1.000000e+00 : f32
    %278 = vector.broadcast %cst_50 : f32 to vector<2x96xf32>
    %279 = arith.addf %278, %277 : vector<2x96xf32>
    %280 = arith.divf %278, %279 : vector<2x96xf32>
    %281 = vector.extract_strided_slice %280 {offsets = [0, 0], sizes = [2, 32], strides = [1, 1]} : vector<2x96xf32> to vector<2x32xf32>
    %282 = vector.extract_strided_slice %280 {offsets = [0, 32], sizes = [2, 32], strides = [1, 1]} : vector<2x96xf32> to vector<2x32xf32>
    %283 = vector.extract_strided_slice %280 {offsets = [0, 64], sizes = [2, 32], strides = [1, 1]} : vector<2x96xf32> to vector<2x32xf32>
    %284 = vector.extract_strided_slice %274 {offsets = [0, 96], sizes = [2, 32], strides = [1, 1]} : vector<2x128xf32> to vector<2x32xf32>
    %285 = math.tanh %284 : vector<2x32xf32>
    %286 = arith.mulf %282, %248 : vector<2x32xf32>
    %287 = arith.mulf %281, %285 : vector<2x32xf32>
    %288 = arith.addf %286, %287 : vector<2x32xf32>
    %289 = math.tanh %288 : vector<2x32xf32>
    %290 = arith.mulf %283, %289 : vector<2x32xf32>
    %c12 = arith.constant 12 : index
    %c0_51 = arith.constant 0 : index
    %291 = vector.load %arg10[%c12, %c0_51] : memref<16x32xf32, #tpu.memory_space<vmem>>, vector<2x32xf32>
    tpu.vector_store %arg10[%c12, %c0_51], %290 {strides = array<i32>} : memref<16x32xf32, #tpu.memory_space<vmem>>, vector<2x32xf32>,
    %cst_52 = arith.constant dense<0.000000e+00> : vector<2x128xf32>
    %292 = tpu.matmul %270, %1, %cst_52 {dimension_numbers = #tpu.dot_dimension_numbers<[1], [0], [0], [1], [0, 0, 1, 1], [], []>} : vector<2x32xf32>, vector<32x128xf32>, vector<2x128xf32> -> vector<2x128xf32>
    %293 = vector.extract_strided_slice %10 {offsets = [14, 0], sizes = [2, 128], strides = [1, 1]} : vector<16x128xf32> to vector<2x128xf32>
    %294 = arith.addf %292, %293 : vector<2x128xf32>
    %295 = vector.extract_strided_slice %294 {offsets = [0, 0], sizes = [2, 96], strides = [1, 1]} : vector<2x128xf32> to vector<2x96xf32>
    %296 = arith.negf %295 : vector<2x96xf32>
    %297 = math.exp %296 : vector<2x96xf32>
    %cst_53 = arith.constant 1.000000e+00 : f32
    %298 = vector.broadcast %cst_53 : f32 to vector<2x96xf32>
    %299 = arith.addf %298, %297 : vector<2x96xf32>
    %300 = arith.divf %298, %299 : vector<2x96xf32>
    %301 = vector.extract_strided_slice %300 {offsets = [0, 0], sizes = [2, 32], strides = [1, 1]} : vector<2x96xf32> to vector<2x32xf32>
    %302 = vector.extract_strided_slice %300 {offsets = [0, 32], sizes = [2, 32], strides = [1, 1]} : vector<2x96xf32> to vector<2x32xf32>
    %303 = vector.extract_strided_slice %300 {offsets = [0, 64], sizes = [2, 32], strides = [1, 1]} : vector<2x96xf32> to vector<2x32xf32>
    %304 = vector.extract_strided_slice %294 {offsets = [0, 96], sizes = [2, 32], strides = [1, 1]} : vector<2x128xf32> to vector<2x32xf32>
    %305 = math.tanh %304 : vector<2x32xf32>
    %306 = arith.mulf %302, %268 : vector<2x32xf32>
    %307 = arith.mulf %301, %305 : vector<2x32xf32>
    %308 = arith.addf %306, %307 : vector<2x32xf32>
    %309 = math.tanh %308 : vector<2x32xf32>
    %310 = arith.mulf %303, %309 : vector<2x32xf32>
    %311 = tpu.concatenate %310, %290 in 1 : vector<2x32xf32>, vector<2x32xf32> -> vector<2x64xf32>
    %cst_54 = arith.constant dense<0.000000e+00> : vector<2x128xf32>
    %312 = tpu.matmul %311, %3, %cst_54 {dimension_numbers = #tpu.dot_dimension_numbers<[1], [0], [0], [1], [0, 0, 1, 1], [], []>} : vector<2x64xf32>, vector<64x128xf32>, vector<2x128xf32> -> vector<2x128xf32>
    %313 = vector.broadcast %4 : vector<1x128xf32> to vector<2x128xf32>
    %314 = arith.addf %312, %313 : vector<2x128xf32>
    %315 = vector.extract_strided_slice %314 {offsets = [0, 0], sizes = [2, 96], strides = [1, 1]} : vector<2x128xf32> to vector<2x96xf32>
    %316 = arith.negf %315 : vector<2x96xf32>
    %317 = math.exp %316 : vector<2x96xf32>
    %cst_55 = arith.constant 1.000000e+00 : f32
    %318 = vector.broadcast %cst_55 : f32 to vector<2x96xf32>
    %319 = arith.addf %318, %317 : vector<2x96xf32>
    %320 = arith.divf %318, %319 : vector<2x96xf32>
    %321 = vector.extract_strided_slice %320 {offsets = [0, 0], sizes = [2, 32], strides = [1, 1]} : vector<2x96xf32> to vector<2x32xf32>
    %322 = vector.extract_strided_slice %320 {offsets = [0, 32], sizes = [2, 32], strides = [1, 1]} : vector<2x96xf32> to vector<2x32xf32>
    %323 = vector.extract_strided_slice %320 {offsets = [0, 64], sizes = [2, 32], strides = [1, 1]} : vector<2x96xf32> to vector<2x32xf32>
    %324 = vector.extract_strided_slice %314 {offsets = [0, 96], sizes = [2, 32], strides = [1, 1]} : vector<2x128xf32> to vector<2x32xf32>
    %325 = math.tanh %324 : vector<2x32xf32>
    %326 = arith.mulf %322, %288 : vector<2x32xf32>
    %327 = arith.mulf %321, %325 : vector<2x32xf32>
    %328 = arith.addf %326, %327 : vector<2x32xf32>
    %329 = math.tanh %328 : vector<2x32xf32>
    %330 = arith.mulf %323, %329 : vector<2x32xf32>
    %c14 = arith.constant 14 : index
    %c0_56 = arith.constant 0 : index
    %331 = vector.load %arg10[%c14, %c0_56] : memref<16x32xf32, #tpu.memory_space<vmem>>, vector<2x32xf32>
    tpu.vector_store %arg10[%c14, %c0_56], %330 {strides = array<i32>} : memref<16x32xf32, #tpu.memory_space<vmem>>, vector<2x32xf32>,
    %332 = tpu.concatenate %310, %330 in 0 : vector<2x32xf32>, vector<2x32xf32> -> vector<4x32xf32>
    %c0_57 = arith.constant 0 : index
    %c0_58 = arith.constant 0 : index
    %333 = vector.load %arg9[%c0_57, %c0_58] : memref<4x32xf32, #tpu.memory_space<vmem>>, vector<4x32xf32>
    tpu.vector_store %arg9[%c0_57, %c0_58], %332 {strides = array<i32>} : memref<4x32xf32, #tpu.memory_space<vmem>>, vector<4x32xf32>,
    %c0_59 = arith.constant 0 : index
    %c0_60 = arith.constant 0 : index
    %334 = vector.load %arg10[%c0_59, %c0_60] : memref<16x32xf32, #tpu.memory_space<vmem>>, vector<16x32xf32>
    %cst_61 = arith.constant dense<0.000000e+00> : vector<16x4xf32>
    %335 = tpu.matmul %334, %5, %cst_61 {dimension_numbers = #tpu.dot_dimension_numbers<[1], [0], [0], [1], [0, 0, 1, 1], [], []>} : vector<16x32xf32>, vector<32x4xf32>, vector<16x4xf32> -> vector<16x4xf32>
    %336 = vector.broadcast %6 : vector<1x4xf32> to vector<16x4xf32>
    %337 = arith.addf %335, %336 : vector<16x4xf32>
    %338 = arith.negf %337 : vector<16x4xf32>
    %339 = math.exp %338 : vector<16x4xf32>
    %cst_62 = arith.constant 1.000000e+00 : f32
    %340 = vector.broadcast %cst_62 : f32 to vector<16x4xf32>
    %341 = arith.addf %340, %339 : vector<16x4xf32>
    %342 = arith.divf %340, %341 : vector<16x4xf32>
    %c0_63 = arith.constant 0 : index
    %c0_64 = arith.constant 0 : index
    %343 = vector.load %arg8[%c0_63, %c0_64] : memref<16x4xf32, #tpu.memory_space<vmem>>, vector<16x4xf32>
    tpu.vector_store %arg8[%c0_63, %c0_64], %342 {strides = array<i32>} : memref<16x4xf32, #tpu.memory_space<vmem>>, vector<16x4xf32>,
    return
  }
}

</mosaic_0001>

<bundles_post_ra>
// kernel: lstm_decoder_forward.1
= control target key start
LH: loop header
LB: loop body
LE: loop exit
PB: predicated region body
PF: predicated region fallthrough
CT: control target
= control target key end

     0   :  { %15 = vsyncpa [#allocation4], 0  ;;  %s3218_s0 = inlined_call_operand.vmem [shape: f32[16,16], index: 0, kind: input, shape index: {}]   ;;  %s3219_s1 = inlined_call_operand.vmem [shape: f32[16,128], index: 1, kind: input, shape index: {}]   ;;  %s3220_s2 = inlined_call_operand.hbm [shape: f32[32,128], index: 2, kind: input, shape index: {}]   ;;  %s3221_s3 = inlined_call_operand.vmem [shape: f32[1,128], index: 3, kind: input, shape index: {}]   ;;  %s3222_s4 = inlined_call_operand.vmem [shape: f32[64,128], index: 4, kind: input, shape index: {}]   ;;  %s3223_s5 = inlined_call_operand.vmem [shape: f32[1,128], index: 5, kind: input, shape index: {}]   ;;  %s3224_s6 = inlined_call_operand.vmem [shape: f32[32,4], index: 6, kind: input, shape index: {}]   ;;  %s3225_s7 = inlined_call_operand.vmem [shape: f32[1,4], index: 7, kind: input, shape index: {}]   ;;  %s3226_s8 = inlined_call_operand.vmem [shape: f32[16,4], index: 8, kind: output, shape index: {0}]   ;;  %s3227_s9 = inlined_call_operand.hbm [shape: f32[4,32], index: 9, kind: output, shape index: {1}]  }
   0x1   :  { %16 = vsyncpa [#allocation5], 0  ;;  %s2729_s30 = smov [#allocation3]   ;;  %s2681_s13 = scalar_lea.hbm %s3220_s2, 512 }
   0x2   :  { %s26_s10 = sshll.u32 %s2729_s30, 4  ;;  %p2682_p0 = scmp.ne.s32.totalorder %s3220_s2, %s2681_s13  ;;  %s27_s10 = int_to_ptr.vmem [resolvable:$true] %s26_s10 }
   0x3   :  { %p2685_p1 = scmp.lt.u32.totalorder %s2681_s13, %s3220_s2 }
   0x5   :  { %p2687_p2 = pnand %p2685_p1, %p2682_p0 }
   0x7   :  { %2690 = shalt.err (!%p2687_p2)
}
   0x8   :  { %s2691_s18 = scalar_lea.vmem %s27_s10, 512  ;;  %p2696_p4 = scmp.lt.s32.totalorder %s27_s10, %s27_s10 }
   0x9   :  { %p2692_p3 = scmp.ne.s32.totalorder %s27_s10, %s2691_s18  ;;  %p2697_p5 = scmp.lt.s32.totalorder %s2691_s18, %s2691_s18 }
   0xb   :  { %p2698_p6 = por %p2697_p5, %p2696_p4 }
   0xd   :  { %p2699_p7 = pnand %p2698_p6, %p2692_p3 }
   0xf   :  { %2702 = shalt.err (!%p2699_p7)
}
  0x10   :  { %s2730_s19 = smov 128   ;;  %s2731_s20 = smov 8  }
  0x11   :  { %32 = dma.hbm_to_vmem [thread:$0]  %s3220_s2, 512, %s27_s10, [#allocation4], %s2730_s19, %s2730_s19, %s2731_s20  }
  0x12   :  { %2725 = dma.done.wait [#allocation4], 512  }
  0x13   :  { %2726 = vsyncadd [#allocation4], 4294966784  ;;  %v2732_v0 = vmov 0.0|0.0   ;;  %vm2733_vm0 = vmmov 0   ;;  %v2734_v1 = vmov 0.0   ;;  %vm75_vm1 = vcmask 130048  }
  0x14   :  { %2383 = vmatprep.subr.bf16.mxu1 %v2732_v0  ;;  %2136 = vmatprep.mubr.msk.f32.mxu1 %vm2733_vm0, %v2734_v1  ;;  %v46_v2 = vld [vmem:[%s3219_s1] sm:$0xff]  ;;  %v47_v3 = vld [vmem:[%s3219_s1 + $0x8] sm:$0xff]  ;;  %v48_v4 = vld [vmem:[#allocation3] sm:$0xff]  ;;  %s2735_s30 = smov 32   ;;  %s2736_s25 = smov 64   ;;  %vm157_vm2 = vcmask 261120  }
  0x15   :  { %v2379_v5 = vpack.c.bf16 %v47_v3, %v46_v2  ;;  %v49_v6 = vld [vmem:[#allocation3 + $0x8] sm:$0xff]  ;;  %v67_v7 = vld [vmem:[%s3218_s0] sm:$0xff]  ;;  %v51_v10 = vld [vmem:[#allocation3 + $0x18] sm:$0xff]  ;;  %vm266_vm3 = vcmask 523264   ;;  %vm368_vm4 = vcmask 254976   ;;  %vm1828_vm5 = vcmask 1041408  }
  0x16   :  { %v2813_v8 = vpack.c.bf16 %v49_v6, %v48_v4  ;;  %2125 = vmatprep.mubr.msk.f32.mxu0 %vm75_vm1, %v67_v7  ;;  %v50_v9 = vld [vmem:[#allocation3 + $0x10] sm:$0xff]  ;;  %v68_v11 = vld [vmem:[%s3218_s0 + $0x8] sm:$0xff]  ;;  %v55_v33 = vld [vmem:[%s3222_s4 + $0x10] sm:$0xff]  ;;  %vm1834_vm6 = vcmask 257024  }
  0x17   :  { %2380 = vmatprep.subr.bf16.mxu0 %v2379_v5  ;;  %v2820_v12 = vpack.c.bf16 %v51_v10, %v50_v9  ;;  %v1959_v13 = vld [vmem:[%s3221_s3] ss:$0 sm:$0xff]  ;;  %v54_v32 = vld [vmem:[%s3222_s4 + $0x8] sm:$0xff]  ;;  %v56_v35 = vld [vmem:[%s3222_s4 + $0x18] sm:$0xff] }
  0x18   :  { %2385 = vmatpush3.bf16.msra.mxu1 %v2813_v8  ;;  %2382 = vmatpush3.bf16.msra.mxu0 %v2379_v5  ;;  %v53_v31 = vld [vmem:[%s3222_s4] sm:$0xff]  ;;  %v2864_v36 = vpack.c.bf16 %v56_v35, %v55_v33  ;;  %v58_v38 = vld [vmem:[%s3222_s4 + $0x28] sm:$0xff]  ;;  %v59_v40 = vld [vmem:[%s3222_s4 + $0x30] sm:$0xff] }
  0x19   :  { %2386 = vmatprep.subr.bf16.mxu1 %v2732_v0  ;;  %2389 = vmatprep.subr.bf16.mxu0 %v2732_v0  ;;  %v2858_v34 = vpack.c.bf16 %v54_v32, %v53_v31  ;;  %v57_v37 = vld [vmem:[%s3222_s4 + $0x20] sm:$0xff]  ;;  %v60_v41 = vld [vmem:[%s3222_s4 + $0x38] sm:$0xff] }
  0x1a   :  { %v2874_v39 = vpack.c.bf16 %v58_v38, %v57_v37  ;;  %v2885_v43 = vpack.c.bf16 %v60_v41, %v59_v40  ;;  %v2914_v49 = vld [vmem:[%s3223_s5] ss:$0 sm:$0xff]  ;;  %s2737_s5 = smov 96  }
  0x1b   :  { %2126 = vmatmul.mubr.msk.f32.vlgmr.msra.gmra.mrb[0].mxu0 %vm75_vm1, %v68_v11 }
  0x1c   :  { %2388 = vmatpush3.bf16.msra.mxu1 %v2820_v12  ;;  %2155 = vmatprep.mubr.msk.f32.mxu0 %vm2733_vm0, %v2734_v1 }
  0x1d   :  { %2401 = vmatprep.subr.bf16.mxu1 %v2732_v0  ;;  %2391 = vmatpush3.bf16.msra.mxu0 %v2858_v34 }
  0x1e   :  { %2392 = vmatprep.subr.bf16.mxu0 %v2732_v0 }
  0x1f   :  { %2137 = vmatmul.mubr.f32.vlgmr.msra.gmra.mrb[0].mxu1 %v2734_v1 }
  0x20   :  { %2403 = vmatpush3.bf16.msra.mxu1 %v2813_v8  ;;  %2166 = vmatprep.mubr.msk.f32.mxu1 %vm2733_vm0, %v2734_v1 }
  0x21   :  { %2404 = vmatprep.subr.bf16.mxu1 %v2732_v0  ;;  %2394 = vmatpush3.bf16.msra.mxu0 %v2864_v36 }
  0x22   :  { %2395 = vmatprep.subr.bf16.mxu0 %v2732_v0 }
  0x24   :  { %2406 = vmatpush3.bf16.msra.mxu1 %v2820_v12 }
  0x25   :  { %2407 = vmatprep.subr.bf16.mxu1 %v2732_v0  ;;  %2397 = vmatpush3.bf16.msra.mxu0 %v2874_v39 }
  0x26   :  { %2398 = vmatprep.subr.bf16.mxu0 %v2732_v0 }
  0x29   :  { %2400 = vmatpush3.bf16.msra.mxu0 %v2885_v43 }
  0x2a   :  { %2419 = vmatprep.subr.bf16.mxu0 %v2732_v0 }
  0xee   :  { %v2127_v14 = vpop.f32.mrb[0].mxu0 }
  0xef   :  { %v2839_v15 = vadd.f32 %v2127_v14, %v1959_v13  ;;  %v148_v16 = vpop.f32.mrb[1].mxu0 }
  0xf0   :  { %v2841_v17 = vadd.f32 %v1959_v13, %v148_v16 }
  0xf2   :  { %v227_v18 = vpop.f32.mrb[0].mxu1  ;;  %v371_v48 = vrot.slane %v2841_v17, 2 }
  0xf3   :  { %v228_v19 = vadd.f32 %v227_v18, %v2841_v17  ;;  %v2138_v20 = vpop.f32.mrb[1].mxu1 }
  0xf5   :  { %2545 = vtanh.f32 %v228_v19  ;;  %v1962_v22 = vmul.f32 -1.442695, %v228_v19 }
  0xf7   :  { %2547 = vpow2.f32 %v1962_v22 }
  0xff   :  { %v2546_v21 = vpop.eup %2545 }
 0x100   :  { %240 = vrot.lane.b32.xlu0 %v2546_v21, %s2735_s30 }
 0x101   :  { %v2548_v23 = vpop.eup %2547 }
 0x102   :  { %v234_v24 = vadd.f32 1.0, %v2548_v23 }
 0x104   :  { %2549 = vrcp.f32 %v234_v24 }
 0x10e   :  { %v2550_v25 = vpop.eup %2549 }
 0x10f   :  { %v238_v28 = vmul.f32 0.0, %v2550_v25 }
 0x172   :  { %v241_v26 = vpop.permute.xlu0 %240 }
 0x173   :  { %v243_v27 = vmul.f32 %v2550_v25, %v241_v26 }
 0x175   :  { %245 = vrot.lane.b32.xlu0 %v243_v27, %s2735_s30  ;;  %v579_v27 = vrot.slane %v2841_v17, 4 }
 0x1e7   :  { %v246_v29 = vpop.permute.xlu0 %245 }
 0x1e8   :  { %v2846_v30 = vadd.f32 %v246_v29, %v238_v28 }
 0x1ea   :  { %2551 = vtanh.f32 %v2846_v30 }
 0x1f4   :  { %v2552_v42 = vpop.eup %2551 }
 0x1f5   :  { %251 = vrot.lane.b32.xlu1 %v2552_v42, %s2735_s30 }
 0x267   :  { %v252_v44 = vpop.permute.xlu1 %251 }
 0x268   :  { %v254_v45 = vmul.f32 %v2550_v25, %v252_v44 }
 0x26a   :  { %256 = vrot.lane.b32.xlu1 %v254_v45, %s2736_s25 }
 0x2dc   :  { %v257_v46 = vpop.permute.xlu1 %256 }
 0x2dd   :  { %v259_v47 = vsel %vm157_vm2, %v257_v46, 0.0  ;;  %2167 = vmatmul.mubr.msk.f32.vlgmr.msra.gmra.mrb[2].mxu1 %vm157_vm2, %v257_v46 }
 0x2de   :  { %2156 = vmatmul.mubr.msk.f32.vlgmr.msra.gmra.mrb[2].mxu0 %vm266_vm3, %v259_v47  ;;  %2409 = vmatpush3.bf16.msra.mxu1 %v2858_v34 }
 0x2df   :  { %2410 = vmatprep.subr.bf16.mxu1 %v2732_v0  ;;  %2421 = vmatpush3.bf16.msra.mxu0 %v2813_v8 }
 0x2e0   :  { %2422 = vmatprep.subr.bf16.mxu0 %v2732_v0  ;;  %2196 = vmatprep.mubr.msk.f32.mxu0 %vm2733_vm0, %v2734_v1 }
 0x2e1   :  { %2185 = vmatprep.mubr.msk.f32.mxu1 %vm2733_vm0, %v2734_v1 }
 0x2e2   :  { %2412 = vmatpush3.bf16.msra.mxu1 %v2864_v36 }
 0x2e3   :  { %2413 = vmatprep.subr.bf16.mxu1 %v2732_v0  ;;  %2424 = vmatpush3.bf16.msra.mxu0 %v2820_v12 }
 0x2e4   :  { %2425 = vmatprep.subr.bf16.mxu0 %v2732_v0 }
 0x2e6   :  { %2415 = vmatpush3.bf16.msra.mxu1 %v2874_v39 }
 0x2e7   :  { %2416 = vmatprep.subr.bf16.mxu1 %v2732_v0 }
 0x2ea   :  { %2418 = vmatpush3.bf16.msra.mxu1 %v2885_v43 }
 0x2eb   :  { %2437 = vmatprep.subr.bf16.mxu1 %v2732_v0 }
 0x3b0   :  { %v441_v50 = vpop.f32.mrb[2].mxu1 }
 0x3b1   :  { %v442_v51 = vadd.f32 %v441_v50, %v371_v48  ;;  %v336_v52 = vpop.f32.mrb[2].mxu0  ;;  %v2168_v53 = vpop.f32.mrb[3].mxu1 }
 0x3b2   :  { %v337_v54 = vadd.f32 %v2914_v49, %v336_v52  ;;  %v2157_v55 = vpop.f32.mrb[3].mxu0 }
 0x3b3   :  { %2553 = vtanh.f32 %v442_v51  ;;  %v1967_v58 = vmul.f32 -1.442695, %v442_v51 }
 0x3b4   :  { %2555 = vtanh.f32 %v337_v54  ;;  %v1965_v59 = vmul.f32 -1.442695, %v337_v54 }
 0x3b5   :  { %2557 = vpow2.f32 %v1967_v58 }
 0x3b6   :  { %2559 = vpow2.f32 %v1965_v59 }
 0x3bd   :  { %v2554_v56 = vpop.eup %2553 }
 0x3be   :  { %v2556_v57 = vpop.eup %2555  ;;  %454 = vrot.lane.b32.xlu1 %v2554_v56, %s2735_s30 }
 0x3bf   :  { %349 = vrot.lane.b32.xlu0 %v2556_v57, %s2735_s30  ;;  %v2558_v60 = vpop.eup %2557 }
 0x3c0   :  { %v2560_v61 = vpop.eup %2559  ;;  %v448_v62 = vadd.f32 1.0, %v2558_v60 }
 0x3c1   :  { %v343_v63 = vadd.f32 1.0, %v2560_v61 }
 0x3c2   :  { %2561 = vrcp.f32 %v448_v62 }
 0x3c3   :  { %2563 = vrcp.f32 %v343_v63 }
 0x3cc   :  { %v2562_v2 = vpop.eup %2561 }
 0x3cd   :  { %v2564_v4 = vpop.eup %2563  ;;  %v452_v9 = vmul.f32 %v2562_v2, %v2846_v30 }
 0x3ce   :  { %v347_v11 = vmul.f32 0.0, %v2564_v4 }
 0x430   :  { %v455_v3 = vpop.permute.xlu1 %454 }
 0x431   :  { %v457_v5 = vmul.f32 %v2562_v2, %v455_v3  ;;  %v350_v6 = vpop.permute.xlu0 %349 }
 0x432   :  { %v352_v7 = vmul.f32 %v2564_v4, %v350_v6  ;;  %v787_v6 = vrot.slane %v2841_v17, 6 }
 0x433   :  { %459 = vrot.lane.b32.xlu1 %v457_v5, %s2735_s30 }
 0x434   :  { %354 = vrot.lane.b32.xlu0 %v352_v7, %s2735_s30 }
 0x4a5   :  { %v460_v10 = vpop.permute.xlu1 %459 }
 0x4a6   :  { %v2922_v13 = vadd.f32 %v460_v10, %v452_v9  ;;  %v355_v14 = vpop.permute.xlu0 %354 }
 0x4a7   :  { %v2924_v16 = vadd.f32 %v355_v14, %v347_v11 }
 0x4a8   :  { %2565 = vtanh.f32 %v2922_v13 }
 0x4a9   :  { %2567 = vtanh.f32 %v2924_v16 }
 0x4b2   :  { %v2566_v18 = vpop.eup %2565 }
 0x4b3   :  { %v2568_v19 = vpop.eup %2567  ;;  %465 = vrot.lane.b32.xlu1 %v2566_v18, %s2735_s30 }
 0x4b4   :  { %360 = vrot.lane.b32.xlu0 %v2568_v19, %s2735_s30 }
 0x525   :  { %v466_v20 = vpop.permute.xlu1 %465 }
 0x526   :  { %v468_v21 = vmul.f32 %v2562_v2, %v466_v20  ;;  %v361_v22 = vpop.permute.xlu0 %360 }
 0x527   :  { %v2930_v23 = vmul.f32 %v2564_v4, %v361_v22 }
 0x528   :  { %470 = vrot.lane.b32.xlu0 %v468_v21, %s2736_s25 }
 0x529   :  { %473 = vrot.lane.b32.xlu1 %v2930_v23, %s2737_s5 }
 0x59a   :  { %v471_v24 = vpop.permute.xlu0 %470 }
 0x59b   :  { %v474_v25 = vpop.permute.xlu1 %473  ;;  %2197 = vmatmul.mubr.msk.f32.vlgmr.msra.gmra.mrb[4].mxu0 %vm157_vm2, %v471_v24 }
 0x59c   :  { %v476_v26 = vsel %vm157_vm2, %v471_v24, %v474_v25  ;;  %2427 = vmatpush3.bf16.msra.mxu0 %v2858_v34  ;;  %2215 = vmatprep.mubr.msk.f32.mxu0 %vm2733_vm0, %v2734_v1 }
 0x59d   :  { %2186 = vmatmul.mubr.msk.f32.vlgmr.msra.gmra.mrb[4].mxu1 %vm266_vm3, %v476_v26  ;;  %2428 = vmatprep.subr.bf16.mxu0 %v2732_v0 }
 0x59e   :  { %2439 = vmatpush3.bf16.msra.mxu1 %v2813_v8  ;;  %2226 = vmatprep.mubr.msk.f32.mxu1 %vm2733_vm0, %v2734_v1 }
 0x59f   :  { %2440 = vmatprep.subr.bf16.mxu1 %v2732_v0 }
 0x5a0   :  { %2430 = vmatpush3.bf16.msra.mxu0 %v2864_v36 }
 0x5a1   :  { %2431 = vmatprep.subr.bf16.mxu0 %v2732_v0 }
 0x5a2   :  { %2442 = vmatpush3.bf16.msra.mxu1 %v2820_v12 }
 0x5a3   :  { %2443 = vmatprep.subr.bf16.mxu1 %v2732_v0 }
 0x5a4   :  { %2433 = vmatpush3.bf16.msra.mxu0 %v2874_v39 }
 0x5a5   :  { %2434 = vmatprep.subr.bf16.mxu0 %v2732_v0 }
 0x5a8   :  { %2436 = vmatpush3.bf16.msra.mxu0 %v2885_v43 }
 0x5a9   :  { %2455 = vmatprep.subr.bf16.mxu0 %v2732_v0 }
 0x66e   :  { %v649_v28 = vpop.f32.mrb[4].mxu0 }
 0x66f   :  { %v650_v29 = vadd.f32 %v649_v28, %v579_v27  ;;  %v2198_v30 = vpop.f32.mrb[5].mxu0 }
 0x670   :  { %v546_v31 = vpop.f32.mrb[4].mxu1 }
 0x671   :  { %2569 = vtanh.f32 %v650_v29  ;;  %v547_v32 = vadd.f32 %v2914_v49, %v546_v31  ;;  %v2187_v33 = vpop.f32.mrb[5].mxu1  ;;  %v1971_v38 = vmul.f32 -1.442695, %v650_v29 }
 0x673   :  { %2571 = vtanh.f32 %v547_v32  ;;  %v1969_v40 = vmul.f32 -1.442695, %v547_v32 }
 0x674   :  { %2573 = vpow2.f32 %v1971_v38 }
 0x675   :  { %2575 = vpow2.f32 %v1969_v40 }
 0x67b   :  { %v2570_v35 = vpop.eup %2569 }
 0x67c   :  { %662 = vrot.lane.b32.xlu1 %v2570_v35, %s2735_s30 }
 0x67d   :  { %v2572_v37 = vpop.eup %2571 }
 0x67e   :  { %559 = vrot.lane.b32.xlu0 %v2572_v37, %s2735_s30  ;;  %v2574_v41 = vpop.eup %2573 }
 0x67f   :  { %v2576_v42 = vpop.eup %2575  ;;  %v656_v44 = vadd.f32 1.0, %v2574_v41 }
 0x680   :  { %v553_v45 = vadd.f32 1.0, %v2576_v42 }
 0x681   :  { %2577 = vrcp.f32 %v656_v44 }
 0x682   :  { %2579 = vrcp.f32 %v553_v45 }
 0x68b   :  { %v2578_v46 = vpop.eup %2577 }
 0x68c   :  { %v2580_v50 = vpop.eup %2579  ;;  %v660_v53 = vmul.f32 %v2578_v46, %v2922_v13 }
 0x68d   :  { %v557_v56 = vmul.f32 %v2580_v50, %v2924_v16 }
 0x6ee   :  { %v663_v47 = vpop.permute.xlu1 %662 }
 0x6ef   :  { %v665_v48 = vmul.f32 %v2578_v46, %v663_v47 }
 0x6f0   :  { %v560_v51 = vpop.permute.xlu0 %559 }
 0x6f1   :  { %667 = vrot.lane.b32.xlu1 %v665_v48, %s2735_s30  ;;  %v562_v52 = vmul.f32 %v2580_v50, %v560_v51 }
 0x6f3   :  { %564 = vrot.lane.b32.xlu0 %v562_v52, %s2735_s30 }
 0x763   :  { %v668_v54 = vpop.permute.xlu1 %667 }
 0x764   :  { %v2961_v55 = vadd.f32 %v668_v54, %v660_v53 }
 0x765   :  { %v565_v57 = vpop.permute.xlu0 %564 }
 0x766   :  { %2581 = vtanh.f32 %v2961_v55  ;;  %v2965_v58 = vadd.f32 %v565_v57, %v557_v56 }
 0x768   :  { %2583 = vtanh.f32 %v2965_v58 }
 0x770   :  { %v2582_v59 = vpop.eup %2581 }
 0x771   :  { %673 = vrot.lane.b32.xlu1 %v2582_v59, %s2735_s30 }
 0x772   :  { %v2584_v60 = vpop.eup %2583 }
 0x773   :  { %570 = vrot.lane.b32.xlu0 %v2584_v60, %s2735_s30 }
 0x7e3   :  { %v674_v61 = vpop.permute.xlu1 %673 }
 0x7e4   :  { %v676_v62 = vmul.f32 %v2578_v46, %v674_v61 }
 0x7e5   :  { %v571_v63 = vpop.permute.xlu0 %570 }
 0x7e6   :  { %678 = vrot.lane.b32.xlu0 %v676_v62, %s2736_s25  ;;  %v2971_v2 = vmul.f32 %v2580_v50, %v571_v63 }
 0x7e8   :  { %681 = vrot.lane.b32.xlu1 %v2971_v2, %s2737_s5 }
 0x858   :  { %v679_v3 = vpop.permute.xlu0 %678 }
 0x859   :  { %2227 = vmatmul.mubr.msk.f32.vlgmr.msra.gmra.mrb[6].mxu1 %vm157_vm2, %v679_v3 }
 0x85a   :  { %2445 = vmatpush3.bf16.msra.mxu1 %v2858_v34  ;;  %2245 = vmatprep.mubr.msk.f32.mxu1 %vm2733_vm0, %v2734_v1  ;;  %v682_v4 = vpop.permute.xlu1 %681 }
 0x85b   :  { %2446 = vmatprep.subr.bf16.mxu1 %v2732_v0  ;;  %v684_v5 = vsel %vm157_vm2, %v679_v3, %v682_v4 }
 0x85c   :  { %2216 = vmatmul.mubr.msk.f32.vlgmr.msra.gmra.mrb[6].mxu0 %vm266_vm3, %v684_v5 }
 0x85d   :  { %2457 = vmatpush3.bf16.msra.mxu0 %v2813_v8  ;;  %2256 = vmatprep.mubr.msk.f32.mxu0 %vm2733_vm0, %v2734_v1 }
 0x85e   :  { %2448 = vmatpush3.bf16.msra.mxu1 %v2864_v36  ;;  %2458 = vmatprep.subr.bf16.mxu0 %v2732_v0 }
 0x85f   :  { %2449 = vmatprep.subr.bf16.mxu1 %v2732_v0 }
 0x861   :  { %2460 = vmatpush3.bf16.msra.mxu0 %v2820_v12 }
 0x862   :  { %2451 = vmatpush3.bf16.msra.mxu1 %v2874_v39  ;;  %2461 = vmatprep.subr.bf16.mxu0 %v2732_v0 }
 0x863   :  { %2452 = vmatprep.subr.bf16.mxu1 %v2732_v0 }
 0x866   :  { %2454 = vmatpush3.bf16.msra.mxu1 %v2885_v43 }
 0x867   :  { %2473 = vmatprep.subr.bf16.mxu1 %v2732_v0 }
 0x92c   :  { %v857_v7 = vpop.f32.mrb[6].mxu1 }
 0x92d   :  { %v858_v9 = vadd.f32 %v857_v7, %v787_v6  ;;  %v2228_v10 = vpop.f32.mrb[7].mxu1 }
 0x92f   :  { %2585 = vtanh.f32 %v858_v9  ;;  %v754_v11 = vpop.f32.mrb[6].mxu0  ;;  %v1975_v19 = vmul.f32 -1.442695, %v858_v9 }
 0x930   :  { %v755_v13 = vadd.f32 %v2914_v49, %v754_v11  ;;  %v2217_v14 = vpop.f32.mrb[7].mxu0 }
 0x932   :  { %2587 = vtanh.f32 %v755_v13  ;;  %v1973_v20 = vmul.f32 -1.442695, %v755_v13 }
 0x933   :  { %2589 = vpow2.f32 %v1975_v19 }
 0x934   :  { %2591 = vpow2.f32 %v1973_v20 }
 0x939   :  { %v2586_v16 = vpop.eup %2585 }
 0x93a   :  { %870 = vrot.lane.b32.xlu1 %v2586_v16, %s2735_s30 }
 0x93c   :  { %v2588_v18 = vpop.eup %2587 }
 0x93d   :  { %767 = vrot.lane.b32.xlu0 %v2588_v18, %s2735_s30  ;;  %v2590_v17 = vpop.eup %2589 }
 0x93e   :  { %v864_v21 = vadd.f32 1.0, %v2590_v17  ;;  %v2592_v22 = vpop.eup %2591 }
 0x93f   :  { %v761_v24 = vadd.f32 1.0, %v2592_v22 }
 0x940   :  { %2593 = vrcp.f32 %v864_v21 }
 0x941   :  { %2595 = vrcp.f32 %v761_v24 }
 0x94a   :  { %v2594_v25 = vpop.eup %2593 }
 0x94b   :  { %v2596_v28 = vpop.eup %2595  ;;  %v868_v31 = vmul.f32 %v2594_v25, %v2961_v55 }
 0x94c   :  { %v765_v35 = vmul.f32 %v2596_v28, %v2965_v58 }
 0x9ac   :  { %v871_v26 = vpop.permute.xlu1 %870 }
 0x9ad   :  { %v873_v27 = vmul.f32 %v2594_v25, %v871_v26 }
 0x9af   :  { %875 = vrot.lane.b32.xlu1 %v873_v27, %s2735_s30  ;;  %v768_v29 = vpop.permute.xlu0 %767 }
 0x9b0   :  { %v770_v30 = vmul.f32 %v2596_v28, %v768_v29  ;;  %v1202_v29 = vrot.slane %v2839_v15, 2 }
 0x9b2   :  { %772 = vrot.lane.b32.xlu0 %v770_v30, %s2735_s30 }
 0xa21   :  { %v876_v32 = vpop.permute.xlu1 %875 }
 0xa22   :  { %v3001_v33 = vadd.f32 %v876_v32, %v868_v31 }
 0xa24   :  { %2597 = vtanh.f32 %v3001_v33  ;;  %v773_v37 = vpop.permute.xlu0 %772 }
 0xa25   :  { %v3005_v38 = vadd.f32 %v773_v37, %v765_v35 }
 0xa27   :  { %2599 = vtanh.f32 %v3005_v38 }
 0xa2e   :  { %v2598_v40 = vpop.eup %2597 }
 0xa2f   :  { %881 = vrot.lane.b32.xlu1 %v2598_v40, %s2735_s30 }
 0xa31   :  { %v2600_v41 = vpop.eup %2599 }
 0xa32   :  { %778 = vrot.lane.b32.xlu0 %v2600_v41, %s2735_s30 }
 0xaa1   :  { %v882_v42 = vpop.permute.xlu1 %881 }
 0xaa2   :  { %v884_v44 = vmul.f32 %v2594_v25, %v882_v42 }
 0xaa4   :  { %886 = vrot.lane.b32.xlu0 %v884_v44, %s2736_s25  ;;  %v779_v45 = vpop.permute.xlu0 %778 }
 0xaa5   :  { %v3011_v46 = vmul.f32 %v2596_v28, %v779_v45 }
 0xaa7   :  { %889 = vrot.lane.b32.xlu1 %v3011_v46, %s2737_s5 }
 0xb16   :  { %v887_v47 = vpop.permute.xlu0 %886 }
 0xb17   :  { %2257 = vmatmul.mubr.msk.f32.vlgmr.msra.gmra.mrb[8].mxu0 %vm157_vm2, %v887_v47 }
 0xb18   :  { %2463 = vmatpush3.bf16.msra.mxu0 %v2858_v34  ;;  %2275 = vmatprep.mubr.msk.f32.mxu0 %vm2733_vm0, %v2734_v1 }
 0xb19   :  { %2464 = vmatprep.subr.bf16.mxu0 %v2732_v0  ;;  %v890_v48 = vpop.permute.xlu1 %889 }
 0xb1a   :  { %v892_v50 = vsel %vm157_vm2, %v887_v47, %v890_v48 }
 0xb1b   :  { %2246 = vmatmul.mubr.msk.f32.vlgmr.msra.gmra.mrb[8].mxu1 %vm266_vm3, %v892_v50 }
 0xb1c   :  { %2466 = vmatpush3.bf16.msra.mxu0 %v2864_v36  ;;  %2475 = vmatpush3.bf16.msra.mxu1 %v2813_v8 }
 0xb1d   :  { %2467 = vmatprep.subr.bf16.mxu0 %v2732_v0  ;;  %2476 = vmatprep.subr.bf16.mxu1 %v2732_v0 }
 0xb1e   :  { %2286 = vmatprep.mubr.msk.f32.mxu1 %vm2733_vm0, %v2734_v1 }
 0xb20   :  { %2469 = vmatpush3.bf16.msra.mxu0 %v2874_v39  ;;  %2478 = vmatpush3.bf16.msra.mxu1 %v2820_v12 }
 0xb21   :  { %2470 = vmatprep.subr.bf16.mxu0 %v2732_v0  ;;  %2479 = vmatprep.subr.bf16.mxu1 %v2732_v0 }
 0xb24   :  { %2472 = vmatpush3.bf16.msra.mxu0 %v2885_v43 }
 0xb25   :  { %2491 = vmatprep.subr.bf16.mxu0 %v2732_v0 }
 0xbea   :  { %v1063_v51 = vpop.f32.mrb[8].mxu0 }
 0xbeb   :  { %v1064_v52 = vadd.f32 %v1063_v51, %v2839_v15  ;;  %v2258_v53 = vpop.f32.mrb[9].mxu0 }
 0xbed   :  { %2601 = vtanh.f32 %v1064_v52  ;;  %v1979_v59 = vmul.f32 -1.442695, %v1064_v52 }
 0xbee   :  { %v962_v54 = vpop.f32.mrb[8].mxu1 }
 0xbef   :  { %v963_v55 = vadd.f32 %v2914_v49, %v962_v54  ;;  %v2247_v56 = vpop.f32.mrb[9].mxu1 }
 0xbf1   :  { %2603 = vtanh.f32 %v963_v55  ;;  %v1977_v60 = vmul.f32 -1.442695, %v963_v55 }
 0xbf2   :  { %2605 = vpow2.f32 %v1979_v59 }
 0xbf3   :  { %2607 = vpow2.f32 %v1977_v60 }
 0xbf7   :  { %v2602_v57 = vpop.eup %2601 }
 0xbf8   :  { %1076 = vrot.lane.b32.xlu1 %v2602_v57, %s2735_s30 }
 0xbfb   :  { %v2604_v58 = vpop.eup %2603 }
 0xbfc   :  { %975 = vrot.lane.b32.xlu0 %v2604_v58, %s2735_s30  ;;  %v2606_v61 = vpop.eup %2605 }
 0xbfd   :  { %v1070_v62 = vadd.f32 1.0, %v2606_v61  ;;  %v2608_v63 = vpop.eup %2607 }
 0xbfe   :  { %v969_v3 = vadd.f32 1.0, %v2608_v63 }
 0xbff   :  { %2609 = vrcp.f32 %v1070_v62 }
 0xc00   :  { %2611 = vrcp.f32 %v969_v3 }
 0xc09   :  { %v2610_v4 = vpop.eup %2609 }
 0xc0a   :  { %v2612_v7 = vpop.eup %2611  ;;  %v1074_v11 = vmul.f32 %v2610_v4, %v3001_v33 }
 0xc0b   :  { %v973_v16 = vmul.f32 %v2612_v7, %v3005_v38 }
 0xc6a   :  { %v1077_v5 = vpop.permute.xlu1 %1076 }
 0xc6b   :  { %v1079_v6 = vmul.f32 %v2610_v4, %v1077_v5 }
 0xc6d   :  { %1081 = vrot.lane.b32.xlu1 %v1079_v6, %s2735_s30 }
 0xc6e   :  { %v976_v9 = vpop.permute.xlu0 %975 }
 0xc6f   :  { %v978_v10 = vmul.f32 %v2612_v7, %v976_v9 }
 0xc71   :  { %980 = vrot.lane.b32.xlu0 %v978_v10, %s2735_s30 }
 0xcdf   :  { %v1082_v13 = vpop.permute.xlu1 %1081 }
 0xce0   :  { %v3041_v14 = vadd.f32 %v1082_v13, %v1074_v11  ;;  %v1410_v11 = vrot.slane %v2839_v15, 4 }
 0xce2   :  { %2613 = vtanh.f32 %v3041_v14 }
 0xce3   :  { %v981_v18 = vpop.permute.xlu0 %980 }
 0xce4   :  { %v3045_v19 = vadd.f32 %v981_v18, %v973_v16 }
 0xce6   :  { %2615 = vtanh.f32 %v3045_v19 }
 0xcec   :  { %v2614_v20 = vpop.eup %2613 }
 0xced   :  { %1087 = vrot.lane.b32.xlu1 %v2614_v20, %s2735_s30 }
 0xcf0   :  { %v2616_v17 = vpop.eup %2615 }
 0xcf1   :  { %986 = vrot.lane.b32.xlu0 %v2616_v17, %s2735_s30 }
 0xd5f   :  { %v1088_v21 = vpop.permute.xlu1 %1087 }
 0xd60   :  { %v1090_v22 = vmul.f32 %v2610_v4, %v1088_v21 }
 0xd62   :  { %1092 = vrot.lane.b32.xlu0 %v1090_v22, %s2736_s25 }
 0xd63   :  { %v987_v24 = vpop.permute.xlu0 %986 }
 0xd64   :  { %v3051_v25 = vmul.f32 %v2612_v7, %v987_v24 }
 0xd66   :  { %1095 = vrot.lane.b32.xlu1 %v3051_v25, %s2737_s5 }
 0xdd4   :  { %v1093_v26 = vpop.permute.xlu0 %1092 }
 0xdd5   :  { %2287 = vmatmul.mubr.msk.f32.vlgmr.msra.gmra.mrb[10].mxu1 %vm157_vm2, %v1093_v26 }
 0xdd6   :  { %2481 = vmatpush3.bf16.msra.mxu1 %v2858_v34  ;;  %2305 = vmatprep.mubr.msk.f32.mxu1 %vm2733_vm0, %v2734_v1 }
 0xdd7   :  { %2482 = vmatprep.subr.bf16.mxu1 %v2732_v0 }
 0xdd8   :  { %v1096_v27 = vpop.permute.xlu1 %1095 }
 0xdd9   :  { %v1098_v28 = vsel %vm157_vm2, %v1093_v26, %v1096_v27 }
 0xdda   :  { %2484 = vmatpush3.bf16.msra.mxu1 %v2864_v36  ;;  %2276 = vmatmul.mubr.msk.f32.vlgmr.msra.gmra.mrb[10].mxu0 %vm266_vm3, %v1098_v28 }
 0xddb   :  { %2485 = vmatprep.subr.bf16.mxu1 %v2732_v0  ;;  %2493 = vmatpush3.bf16.msra.mxu0 %v2813_v8 }
 0xddc   :  { %2316 = vmatprep.mubr.msk.f32.mxu0 %vm2733_vm0, %v2734_v1  ;;  %2494 = vmatprep.subr.bf16.mxu0 %v2732_v0 }
 0xdde   :  { %2487 = vmatpush3.bf16.msra.mxu1 %v2874_v39 }
 0xddf   :  { %2488 = vmatprep.subr.bf16.mxu1 %v2732_v0  ;;  %2496 = vmatpush3.bf16.msra.mxu0 %v2820_v12 }
 0xde0   :  { %2497 = vmatprep.subr.bf16.mxu0 %v2732_v0 }
 0xde2   :  { %2490 = vmatpush3.bf16.msra.mxu1 %v2885_v43 }
 0xde3   :  { %2509 = vmatprep.subr.bf16.mxu1 %v2732_v0 }
 0xea8   :  { %v1272_v30 = vpop.f32.mrb[10].mxu1 }
 0xea9   :  { %v1273_v31 = vadd.f32 %v1272_v30, %v1202_v29  ;;  %v2288_v32 = vpop.f32.mrb[11].mxu1 }
 0xeab   :  { %2617 = vtanh.f32 %v1273_v31  ;;  %v1983_v41 = vmul.f32 -1.442695, %v1273_v31 }
 0xead   :  { %v1168_v33 = vpop.f32.mrb[10].mxu0 }
 0xeae   :  { %v1169_v35 = vadd.f32 %v2914_v49, %v1168_v33  ;;  %v2277_v37 = vpop.f32.mrb[11].mxu0 }
 0xeb0   :  { %2619 = vtanh.f32 %v1169_v35  ;;  %v1981_v42 = vmul.f32 -1.442695, %v1169_v35 }
 0xeb1   :  { %2621 = vpow2.f32 %v1983_v41 }
 0xeb2   :  { %2623 = vpow2.f32 %v1981_v42 }
 0xeb5   :  { %v2618_v38 = vpop.eup %2617 }
 0xeb6   :  { %1285 = vrot.lane.b32.xlu1 %v2618_v38, %s2735_s30 }
 0xeba   :  { %v2620_v40 = vpop.eup %2619 }
 0xebb   :  { %1181 = vrot.lane.b32.xlu0 %v2620_v40, %s2735_s30  ;;  %v2622_v44 = vpop.eup %2621 }
 0xebc   :  { %v1279_v45 = vadd.f32 1.0, %v2622_v44  ;;  %v2624_v47 = vpop.eup %2623 }
 0xebd   :  { %v1175_v48 = vadd.f32 1.0, %v2624_v47 }
 0xebe   :  { %2625 = vrcp.f32 %v1279_v45 }
 0xebf   :  { %2627 = vrcp.f32 %v1175_v48 }
 0xec8   :  { %v2626_v50 = vpop.eup %2625 }
 0xec9   :  { %v2628_v53 = vpop.eup %2627  ;;  %v1283_v56 = vmul.f32 %v2626_v50, %v3041_v14 }
 0xeca   :  { %v1179_v59 = vmul.f32 %v2628_v53, %v3045_v19 }
 0xf28   :  { %v1286_v51 = vpop.permute.xlu1 %1285 }
 0xf29   :  { %v1288_v52 = vmul.f32 %v2626_v50, %v1286_v51 }
 0xf2b   :  { %1290 = vrot.lane.b32.xlu1 %v1288_v52, %s2735_s30 }
 0xf2d   :  { %v1182_v54 = vpop.permute.xlu0 %1181 }
 0xf2e   :  { %v1184_v55 = vmul.f32 %v2628_v53, %v1182_v54 }
 0xf30   :  { %1186 = vrot.lane.b32.xlu0 %v1184_v55, %s2735_s30 }
 0xf9d   :  { %v1291_v57 = vpop.permute.xlu1 %1290 }
 0xf9e   :  { %v3081_v58 = vadd.f32 %v1291_v57, %v1283_v56 }
 0xfa0   :  { %2629 = vtanh.f32 %v3081_v58 }
 0xfa2   :  { %v1187_v60 = vpop.permute.xlu0 %1186 }
 0xfa3   :  { %v3085_v61 = vadd.f32 %v1187_v60, %v1179_v59 }
 0xfa5   :  { %2631 = vtanh.f32 %v3085_v61 }
 0xfaa   :  { %v2630_v62 = vpop.eup %2629 }
 0xfab   :  { %1296 = vrot.lane.b32.xlu1 %v2630_v62, %s2735_s30 }
 0xfaf   :  { %v2632_v63 = vpop.eup %2631 }
 0xfb0   :  { %1192 = vrot.lane.b32.xlu0 %v2632_v63, %s2735_s30 }
0x101d   :  { %v1297_v3 = vpop.permute.xlu1 %1296 }
0x101e   :  { %v1299_v4 = vmul.f32 %v2626_v50, %v1297_v3 }
0x1020   :  { %1301 = vrot.lane.b32.xlu0 %v1299_v4, %s2736_s25 }
0x1022   :  { %v1193_v5 = vpop.permute.xlu0 %1192 }
0x1023   :  { %v3091_v6 = vmul.f32 %v2628_v53, %v1193_v5 }
0x1025   :  { %1304 = vrot.lane.b32.xlu1 %v3091_v6, %s2737_s5 }
0x1092   :  { %v1302_v7 = vpop.permute.xlu0 %1301 }
0x1093   :  { %2317 = vmatmul.mubr.msk.f32.vlgmr.msra.gmra.mrb[12].mxu0 %vm157_vm2, %v1302_v7 }
0x1094   :  { %2499 = vmatpush3.bf16.msra.mxu0 %v2858_v34  ;;  %2335 = vmatprep.mubr.msk.f32.mxu0 %vm2733_vm0, %v2734_v1 }
0x1095   :  { %2500 = vmatprep.subr.bf16.mxu0 %v2732_v0 }
0x1097   :  { %v1305_v9 = vpop.permute.xlu1 %1304 }
0x1098   :  { %2502 = vmatpush3.bf16.msra.mxu0 %v2864_v36  ;;  %v1307_v10 = vsel %vm157_vm2, %v1302_v7, %v1305_v9 }
0x1099   :  { %2503 = vmatprep.subr.bf16.mxu0 %v2732_v0  ;;  %2306 = vmatmul.mubr.msk.f32.vlgmr.msra.gmra.mrb[12].mxu1 %vm266_vm3, %v1307_v10 }
0x109a   :  { %2511 = vmatpush3.bf16.msra.mxu1 %v2813_v8  ;;  %2346 = vmatprep.mubr.msk.f32.mxu1 %vm2733_vm0, %v2734_v1 }
0x109b   :  { %2512 = vmatprep.subr.bf16.mxu1 %v2732_v0 }
0x109c   :  { %2505 = vmatpush3.bf16.msra.mxu0 %v2874_v39 }
0x109d   :  { %2506 = vmatprep.subr.bf16.mxu0 %v2732_v0 }
0x109e   :  { %2514 = vmatpush3.bf16.msra.mxu1 %v2820_v12 }
0x109f   :  { %2515 = vmatprep.subr.bf16.mxu1 %v2732_v0 }
0x10a0   :  { %2508 = vmatpush3.bf16.msra.mxu0 %v2885_v43 }
0x1166   :  { %v1480_v13 = vpop.f32.mrb[12].mxu0 }
0x1167   :  { %v1481_v14 = vadd.f32 %v1480_v13, %v1410_v11  ;;  %v2318_v8 = vpop.f32.mrb[13].mxu0 }
0x1169   :  { %2633 = vtanh.f32 %v1481_v14  ;;  %v1987_v12 = vmul.f32 -1.442695, %v1481_v14 }
0x116c   :  { %v1377_v16 = vpop.f32.mrb[12].mxu1 }
0x116d   :  { %v1378_v18 = vadd.f32 %v2914_v49, %v1377_v16  ;;  %v2307_v19 = vpop.f32.mrb[13].mxu1 }
0x116f   :  { %2635 = vtanh.f32 %v1378_v18  ;;  %v1985_v21 = vmul.f32 -1.442695, %v1378_v18 }
0x1170   :  { %2637 = vpow2.f32 %v1987_v12 }
0x1171   :  { %2639 = vpow2.f32 %v1985_v21 }
0x1173   :  { %v2634_v20 = vpop.eup %2633 }
0x1174   :  { %1493 = vrot.lane.b32.xlu1 %v2634_v20, %s2735_s30 }
0x1179   :  { %v2636_v17 = vpop.eup %2635 }
0x117a   :  { %1390 = vrot.lane.b32.xlu0 %v2636_v17, %s2735_s30  ;;  %v2638_v22 = vpop.eup %2637 }
0x117b   :  { %v1487_v24 = vadd.f32 1.0, %v2638_v22  ;;  %v2640_v26 = vpop.eup %2639 }
0x117c   :  { %v1384_v27 = vadd.f32 1.0, %v2640_v26 }
0x117d   :  { %2641 = vrcp.f32 %v1487_v24 }
0x117e   :  { %2643 = vrcp.f32 %v1384_v27 }
0x1187   :  { %v2642_v28 = vpop.eup %2641 }
0x1188   :  { %v2644_v31 = vpop.eup %2643  ;;  %v1491_v35 = vmul.f32 %v2642_v28, %v3081_v58 }
0x1189   :  { %v1388_v40 = vmul.f32 %v2644_v31, %v3085_v61 }
0x11e6   :  { %v1494_v29 = vpop.permute.xlu1 %1493 }
0x11e7   :  { %v1496_v30 = vmul.f32 %v2642_v28, %v1494_v29 }
0x11e9   :  { %1498 = vrot.lane.b32.xlu1 %v1496_v30, %s2735_s30 }
0x11ec   :  { %v1391_v32 = vpop.permute.xlu0 %1390 }
0x11ed   :  { %v1393_v33 = vmul.f32 %v2644_v31, %v1391_v32 }
0x11ef   :  { %1395 = vrot.lane.b32.xlu0 %v1393_v33, %s2735_s30 }
0x125b   :  { %v1499_v37 = vpop.permute.xlu1 %1498 }
0x125c   :  { %v1501_v38 = vadd.f32 %v1499_v37, %v1491_v35 }
0x125e   :  { %2645 = vtanh.f32 %v1501_v38 }
0x1261   :  { %v1396_v41 = vpop.permute.xlu0 %1395 }
0x1262   :  { %v1398_v42 = vadd.f32 %v1396_v41, %v1388_v40 }
0x1264   :  { %2647 = vtanh.f32 %v1398_v42 }
0x1268   :  { %v2646_v44 = vpop.eup %2645 }
0x1269   :  { %1504 = vrot.lane.b32.xlu1 %v2646_v44, %s2735_s30 }
0x126e   :  { %v2648_v45 = vpop.eup %2647 }
0x126f   :  { %1401 = vrot.lane.b32.xlu0 %v2648_v45, %s2735_s30 }
0x12db   :  { %v1505_v47 = vpop.permute.xlu1 %1504 }
0x12dc   :  { %v1507_v48 = vmul.f32 %v2642_v28, %v1505_v47  ;;  %v63_v47 = vld [vmem:[%s3224_s6 + $0x8] sm:$0xff] }
0x12de   :  { %1509 = vrot.lane.b32.xlu0 %v1507_v48, %s2736_s25 }
0x12e1   :  { %v1402_v50 = vpop.permute.xlu0 %1401 }
0x12e2   :  { %v3124_v51 = vmul.f32 %v2644_v31, %v1402_v50 }
0x12e4   :  { %1512 = vrot.lane.b32.xlu1 %v3124_v51, %s2737_s5 }
0x1350   :  { %v1510_v52 = vpop.permute.xlu0 %1509 }
0x1351   :  { %2347 = vmatmul.mubr.msk.f32.vlgmr.msra.gmra.mrb[14].mxu1 %vm157_vm2, %v1510_v52 }
0x1352   :  { %2517 = vmatpush3.bf16.msra.mxu1 %v2858_v34  ;;  %2365 = vmatprep.mubr.msk.f32.mxu1 %vm2733_vm0, %v2734_v1  ;;  %v1618_v34 = vrot.slane %v2839_v15, 6 }
0x1353   :  { %2518 = vmatprep.subr.bf16.mxu1 %v2732_v0 }
0x1356   :  { %2520 = vmatpush3.bf16.msra.mxu1 %v2864_v36  ;;  %v1513_v53 = vpop.permute.xlu1 %1512 }
0x1357   :  { %2521 = vmatprep.subr.bf16.mxu1 %v2732_v0  ;;  %v1515_v54 = vsel %vm157_vm2, %v1510_v52, %v1513_v53 }
0x1358   :  { %2336 = vmatmul.mubr.msk.f32.vlgmr.msra.gmra.mrb[14].mxu0 %vm266_vm3, %v1515_v54 }
0x135a   :  { %2523 = vmatpush3.bf16.msra.mxu1 %v2874_v39 }
0x135b   :  { %2524 = vmatprep.subr.bf16.mxu1 %v2732_v0 }
0x135e   :  { %2526 = vmatpush3.bf16.msra.mxu1 %v2885_v43 }
0x1424   :  { %v1688_v1 = vpop.f32.mrb[14].mxu1 }
0x1425   :  { %v1689_v55 = vadd.f32 %v1688_v1, %v1618_v34  ;;  %v2348_v56 = vpop.f32.mrb[15].mxu1 }
0x1427   :  { %2649 = vtanh.f32 %v1689_v55  ;;  %v1991_v0 = vmul.f32 -1.442695, %v1689_v55 }
0x142b   :  { %v1585_v36 = vpop.f32.mrb[14].mxu0 }
0x142c   :  { %v1586_v57 = vadd.f32 %v2914_v49, %v1585_v36  ;;  %v2337_v58 = vpop.f32.mrb[15].mxu0 }
0x142e   :  { %2651 = vtanh.f32 %v1586_v57  ;;  %v1989_v39 = vmul.f32 -1.442695, %v1586_v57 }
0x142f   :  { %2653 = vpow2.f32 %v1991_v0 }
0x1430   :  { %2655 = vpow2.f32 %v1989_v39 }
0x1431   :  { %v2650_v59 = vpop.eup %2649 }
0x1432   :  { %1701 = vrot.lane.b32.xlu1 %v2650_v59, %s2735_s30 }
0x1438   :  { %v2652_v60 = vpop.eup %2651 }
0x1439   :  { %1598 = vrot.lane.b32.xlu0 %v2652_v60, %s2735_s30  ;;  %v2654_v15 = vpop.eup %2653 }
0x143a   :  { %v1695_v43 = vadd.f32 1.0, %v2654_v15  ;;  %v2656_v61 = vpop.eup %2655 }
0x143b   :  { %v1592_v62 = vadd.f32 1.0, %v2656_v61 }
0x143c   :  { %2657 = vrcp.f32 %v1695_v43 }
0x143d   :  { %2659 = vrcp.f32 %v1592_v62 }
0x1446   :  { %v2658_v63 = vpop.eup %2657 }
0x1447   :  { %v2660_v5 = vpop.eup %2659  ;;  %v1699_v10 = vmul.f32 %v2658_v63, %v1501_v38 }
0x1448   :  { %v1596_v14 = vmul.f32 %v2660_v5, %v1398_v42 }
0x14a4   :  { %v1702_v3 = vpop.permute.xlu1 %1701 }
0x14a5   :  { %v1704_v4 = vmul.f32 %v2658_v63, %v1702_v3 }
0x14a7   :  { %1706 = vrot.lane.b32.xlu1 %v1704_v4, %s2735_s30 }
0x14ab   :  { %v1599_v7 = vpop.permute.xlu0 %1598 }
0x14ac   :  { %v1601_v9 = vmul.f32 %v2660_v5, %v1599_v7 }
0x14ae   :  { %1603 = vrot.lane.b32.xlu0 %v1601_v9, %s2735_s30 }
0x1519   :  { %v1707_v11 = vpop.permute.xlu1 %1706 }
0x151a   :  { %v1709_v13 = vadd.f32 %v1707_v11, %v1699_v10 }
0x151c   :  { %2661 = vtanh.f32 %v1709_v13 }
0x1520   :  { %v1604_v8 = vpop.permute.xlu0 %1603 }
0x1521   :  { %v1606_v16 = vadd.f32 %v1604_v8, %v1596_v14 }
0x1523   :  { %2663 = vtanh.f32 %v1606_v16 }
0x1526   :  { %v2662_v18 = vpop.eup %2661 }
0x1527   :  { %1712 = vrot.lane.b32.xlu1 %v2662_v18, %s2735_s30 }
0x152d   :  { %v2664_v19 = vpop.eup %2663 }
0x152e   :  { %1609 = vrot.lane.b32.xlu0 %v2664_v19, %s2735_s30 }
0x1599   :  { %v1713_v20 = vpop.permute.xlu1 %1712 }
0x159a   :  { %v3148_v17 = vmul.f32 %v2658_v63, %v1713_v20 }
0x159c   :  { %1717 = vrot.lane.b32.xlu0 %v3148_v17, %s2736_s25 }
0x15a0   :  { %v1610_v12 = vpop.permute.xlu0 %1609 }
0x15a1   :  { %v1612_v21 = vmul.f32 %v2660_v5, %v1610_v12 }
0x15a3   :  { %1720 = vrot.lane.b32.xlu1 %v1612_v21, %s2737_s5 }
0x160e   :  { %v1718_v22 = vpop.permute.xlu0 %1717 }
0x1615   :  { %v1721_v24 = vpop.permute.xlu1 %1720 }
0x1616   :  { %v1723_v26 = vsel %vm157_vm2, %v1718_v22, %v1721_v24 }
0x1617   :  { %2366 = vmatmul.mubr.msk.f32.vlgmr.msra.gmra.mrb[16].mxu1 %vm266_vm3, %v1723_v26 }
0x16ea   :  { %v1793_v27 = vpop.f32.mrb[16].mxu1 }
0x16eb   :  { %v1794_v28 = vadd.f32 %v2914_v49, %v1793_v27  ;;  %v2367_v29 = vpop.f32.mrb[17].mxu1 }
0x16ed   :  { %2665 = vtanh.f32 %v1794_v28  ;;  %v1993_v31 = vmul.f32 -1.442695, %v1794_v28 }
0x16ef   :  { %2667 = vpow2.f32 %v1993_v31 }
0x16f7   :  { %v2666_v30 = vpop.eup %2665 }
0x16f8   :  { %1806 = vrot.lane.b32.xlu0 %v2666_v30, %s2735_s30 }
0x16f9   :  { %v2668_v32 = vpop.eup %2667 }
0x16fa   :  { %v1800_v33 = vadd.f32 1.0, %v2668_v32 }
0x16fc   :  { %2669 = vrcp.f32 %v1800_v33 }
0x1706   :  { %v2670_v35 = vpop.eup %2669 }
0x1707   :  { %v1804_v49 = vmul.f32 %v2670_v35, %v1606_v16 }
0x176a   :  { %v1807_v37 = vpop.permute.xlu0 %1806 }
0x176b   :  { %v1809_v38 = vmul.f32 %v2670_v35, %v1807_v37 }
0x176d   :  { %1811 = vrot.lane.b32.xlu1 %v1809_v38, %s2735_s30 }
0x1771   :  { %365 = vrot.lane.b32.xlu1 %v2930_v23, %s2736_s25 }
0x1775   :  { %783 = vrot.lane.b32.xlu1 %v3011_v46, %s2736_s25 }
0x1779   :  { %1197 = vrot.lane.b32.xlu1 %v3091_v6, %s2736_s25  ;;  %v62_v6 = vld [vmem:[%s3224_s6] sm:$0xff] }
0x177a   :  { %v2527_v48 = vpack.c.bf16 %v63_v47, %v62_v6 }
0x177c   :  { %2528 = vmatprep.subr.bf16.mxu0 %v2527_v48 }
0x177d   :  { %1614 = vrot.lane.b32.xlu1 %v1612_v21, %s2736_s25  ;;  %2530 = vmatpush3.bf16.msra.mxu0 %v2527_v48 }
0x17df   :  { %v1812_v40 = vpop.permute.xlu1 %1811 }
0x17e0   :  { %v1814_v41 = vadd.f32 %v1812_v40, %v1804_v49 }
0x17e2   :  { %2671 = vtanh.f32 %v1814_v41 }
0x17e3   :  { %v366_v42 = vpop.permute.xlu1 %365 }
0x17e4   :  { %369 = vst.msk [vmem:[#allocation2] sm:$0x3] %vm368_vm4, %v366_v42 }
0x17e7   :  { %v784_v44 = vpop.permute.xlu1 %783 }
0x17e8   :  { %786 = vst.msk [vmem:[#allocation2 + $0x4] sm:$0x3] %vm368_vm4, %v784_v44 }
0x17eb   :  { %v1198_v23 = vpop.permute.xlu1 %1197 }
0x17ec   :  { %v2672_v45 = vpop.eup %2671  ;;  %1200 = vst.msk [vmem:[#allocation2 + $0x8] sm:$0x3] %vm368_vm4, %v1198_v23 }
0x17ed   :  { %1817 = vrot.lane.b32.xlu0 %v2672_v45, %s2735_s30 }
0x17ef   :  { %v1615_v46 = vpop.permute.xlu1 %1614 }
0x17f0   :  { %1617 = vst.msk [vmem:[#allocation2 + $0xc] sm:$0x3] %vm368_vm4, %v1615_v46 }
0x17f1   :  { %575 = vrot.lane.b32.xlu0 %v2971_v2, %s2736_s25  ;;  %v64_v2 = vld [vmem:[%s3224_s6 + $0x10] sm:$0xff] }
0x17f5   :  { %991 = vrot.lane.b32.xlu0 %v3051_v25, %s2736_s25  ;;  %v65_v25 = vld [vmem:[%s3224_s6 + $0x18] sm:$0xff]  ;;  %s2738_s6 = smov [#allocation6]  }
0x17f6   :  { %v2531_v50 = vpack.c.bf16 %v65_v25, %v64_v2  ;;  %s1948_s10 = sshll.u32 %s2738_s6, 4  ;;  %s1949_s10 = int_to_ptr.vmem [resolvable:$true] %s1948_s10 }
0x17f7   :  { %s2703_s11 = scalar_lea.vmem %s1949_s10, 64  ;;  %p2708_p9 = scmp.lt.s32.totalorder %s1949_s10, %s1949_s10 }
0x17f8   :  { %2532 = vmatprep.subr.bf16.mxu0 %v2531_v50  ;;  %p2704_p8 = scmp.ne.s32.totalorder %s1949_s10, %s2703_s11  ;;  %p2709_p10 = scmp.lt.s32.totalorder %s2703_s11, %s2703_s11 }
0x17f9   :  { %1406 = vrot.lane.b32.xlu0 %v3124_v51, %s2736_s25  ;;  %2534 = vmatpush3.bf16.msra.mxu0 %v2531_v50 }
0x17fa   :  { %p2710_p11 = por %p2709_p10, %p2708_p9 }
0x17fc   :  { %p2711_p12 = pnand %p2710_p11, %p2704_p8 }
0x185f   :  { %v1818_v51 = vpop.permute.xlu0 %1817 }
0x1860   :  { %v1820_v52 = vmul.f32 %v2670_v35, %v1818_v51 }
0x1862   :  { %v1826_v53 = vrot.slane %v1820_v52, 6  ;;  %1822 = vrot.lane.b32.xlu0 %v1820_v52, %s2736_s25 }
0x1863   :  { %v576_v54 = vpop.permute.xlu0 %575 }
0x1864   :  { %578 = vst.msk [vmem:[#allocation2 + $0x2] sm:$0x3] %vm368_vm4, %v576_v54  ;;  %v1829_v34 = vsel %vm1828_vm5, %v3148_v17, %v1826_v53 }
0x1865   :  { %1831 = vrot.lane.b32.xlu1 %v1829_v34, %s2736_s25 }
0x1867   :  { %v992_v1 = vpop.permute.xlu0 %991 }
0x1868   :  { %994 = vst.msk [vmem:[#allocation2 + $0x6] sm:$0x3] %vm368_vm4, %v992_v1 }
0x186b   :  { %v1407_v55 = vpop.permute.xlu0 %1406 }
0x186c   :  { %1409 = vst.msk [vmem:[#allocation2 + $0xa] sm:$0x3] %vm368_vm4, %v1407_v55 }
0x186f   :  { %v1836_v56 = vld [vmem:[#allocation2] sm:$0xff] }
0x1870   :  { %2376 = vmatprep.mubr.msk.f32.mxu0 %vm157_vm2, %v1836_v56 }
0x18d4   :  { %v1823_v36 = vpop.permute.xlu0 %1822 }
0x18d5   :  { %1825 = vst.msk [vmem:[#allocation2 + $0xe] sm:$0x3] %vm368_vm4, %v1823_v36 }
0x18d7   :  { %v1832_v57 = vpop.permute.xlu1 %1831 }
0x18d8   :  { %1835 = vst.msk [vmem:[#allocation6] sm:$0xf] %vm1834_vm6, %v1832_v57 }
0x18dc   :  { %v1837_v58 = vld [vmem:[#allocation2 + $0x8] sm:$0xff] }
0x18dd   :  { %2377 = vmatmul.mubr.msk.f32.vlgmr.msra.gmra.mrb[16].mxu0 %vm157_vm2, %v1837_v58 }
0x18de   :  { %2714 = shalt.err (!%p2711_p12)
}
0x18df   :  { %s2715_s14 = scalar_lea.hbm %s3227_s9, 64 }
0x18e0   :  { %p2716_p13 = scmp.ne.s32.totalorder %s3227_s9, %s2715_s14  ;;  %p2719_p0 = scmp.lt.u32.totalorder %s2715_s14, %s3227_s9 }
0x18e2   :  { %p2721_p1 = pnand %p2719_p0, %p2716_p13 }
0x18e4   :  { %2724 = shalt.err (!%p2721_p1)
}
0x18e5   :  { %1951 = dma.vmem_to_hbm [thread:$0]  %s1949_s10, 64, %s3227_s9, [#allocation5]   ;;  %v1994_v59 = vld [vmem:[%s3225_s7] ss:$0 sm:$0xff]  ;;  %vm1937_vm7 = vcmask 31744  }
0x19b0   :  { %v2378_v60 = vpop.f32.mrb[16].mxu0 }
0x19b1   :  { %v1922_v0 = vadd.f32 %v2378_v60, %v1994_v59  ;;  %v1916_v39 = vpop.f32.mrb[17].mxu0 }
0x19b2   :  { %v1917_v15 = vadd.f32 %v1994_v59, %v1916_v39 }
0x19b3   :  { %v1998_v43 = vmul.f32 -1.442695, %v1922_v0 }
0x19b4   :  { %v1997_v61 = vmul.f32 -1.442695, %v1917_v15 }
0x19b5   :  { %2673 = vpow2.f32 %v1998_v43 }
0x19b6   :  { %2675 = vpow2.f32 %v1997_v61 }
0x19bf   :  { %v2674_v62 = vpop.eup %2673 }
0x19c0   :  { %v2676_v63 = vpop.eup %2675  ;;  %v1932_v3 = vadd.f32 1.0, %v2674_v62 }
0x19c1   :  { %v1931_v4 = vadd.f32 1.0, %v2676_v63 }
0x19c2   :  { %2677 = vrcp.f32 %v1932_v3 }
0x19c3   :  { %2679 = vrcp.f32 %v1931_v4 }
0x19cc   :  { %v2678_v5 = vpop.eup %2677 }
0x19cd   :  { %v2680_v7 = vpop.eup %2679  ;;  %1939 = vst.msk [vmem:[%s3226_s8 + $0x8] sm:$0xff] %vm1937_vm7, %v2678_v5 }
0x19ce   :  { %1938 = vst.msk [vmem:[%s3226_s8] sm:$0xff] %vm1937_vm7, %v2680_v7 }
0x19cf   :  { %2727 = dma.done.wait [#allocation5], 64  }
0x19d0   :  { %2728 = vsyncadd [#allocation5], 4294967232 }
0x19d1   :  { %1957 = vsyncpa [#allocation4], 1 }
0x19d2   :  { %1958 = vsyncpa [#allocation5], 1 }

</bundles_post_ra>
